<compile_context>
chip_gen: v5e
topology: v5e:2x2
jax: 0.10.0
libtpu: 0.0.40
codegen_flags: <defaults>
</compile_context>

<pallas_src>
import functools
import math

import jax
import jax.numpy as jnp
from jax.experimental import pallas as pl
from jax.experimental.pallas import tpu as pltpu

_BN_EPS = 1e-5
_GELU_C = math.sqrt(2.0 / math.pi)
_VMEM_LIMIT = 48 * 1024 * 1024        # headroom under v7x 64 MiB; raise on v5e/v6e
_ACT_DTYPE = jnp.bfloat16


def _round_up(n, m):
    return (n + m - 1) // m * m


def _gelu(x):
    # tanh-form GELU: the transcendental goes to the EUP slot (near-free).
    # TODO(synk): torch.nn.GELU() default is the exact erf form; the tanh
    # approximation differs by <~1e-3 absolute (covered by the test tolerance).
    return 0.5 * x * (1.0 + jnp.tanh(_GELU_C * (x + 0.044715 * x * x * x)))


def _bn_fold(bn, eps=_BN_EPS):
    scale = bn["gamma"] / jnp.sqrt(bn["rv"] + eps)
    shift = bn["beta"] - bn["rm"] * scale
    return scale, shift


# ---------------------------------------------------------------------------
# Pallas kernels
# ---------------------------------------------------------------------------
def _patch_embed_kernel(x_ref, w_ref, b_ref, scale_ref, shift_ref, o_ref):
    # x_ref: (tm, K) bf16 flattened patches (K un-padded); w_ref: (K, dim) bf16.
    y = jnp.dot(x_ref[...], w_ref[...], preferred_element_type=jnp.float32)
    y = y + b_ref[0, :]
    y = _gelu(y)
    o_ref[...] = (y * scale_ref[0, :] + shift_ref[0, :]).astype(o_ref.dtype)


def _mixer_layer_kernel(x_ref, dw_w_ref, dw_b_ref, s1_ref, t1_ref,
                        pw_w_ref, pw_b_ref, s2_ref, t2_ref,
                        o_ref, *pool_ref, k):
    # One full ConvMixer layer for a single image (batch dim squeezed).
    #   x_ref / o_ref : (Hp, Wp, C)  activations (bf16 in HBM)
    #   dw_w_ref      : (k*k, C)     depthwise taps, row index = dy*k + dx (f32)
    #   pw_w_ref      : (C, C)       pointwise weight (in, out), bf16
    #   *_b / s* / t* : (1, C)       bias / folded-BN scale & shift, f32
    #   pool_ref      : optional (1, C) f32 output — fused global average pool
    pad = k // 2
    Hh, Ww, C = x_ref.shape

    x = x_ref[...].astype(jnp.float32)
    dw_w = dw_w_ref[...]

    # H zero-padding hoisted OUT of the tap loop: one padded slab total.
    zeros_h = jnp.zeros((pad, Ww, C), jnp.float32)
    xp = jnp.concatenate([zeros_h, x, zeros_h], axis=0)   # (Hh + 2*pad, Ww, C)

    # Boundary masks depend only on the W offset: small (1, Ww, C) {0,1}
    # multipliers folded into the per-tap weight (no full-slab select/iota).
    w_idx = jax.lax.broadcasted_iota(jnp.int32, (1, Ww, C), 1)

    acc = None
    for dx in range(k):                      # fully unrolled k*k taps
        ox = dx - pad
        if ox == 0:
            xr = xp
            mask = None
        else:
            # Shift along W via XLU roll (no misaligned sublane slices).
            xr = pltpu.roll(xp, shift=(-ox) % Ww, axis=1)
            mask = jnp.logical_and(w_idx + ox >= 0,
                                   w_idx + ox < Ww).astype(jnp.float32)
        for dy in range(k):
            tap = dw_w[dy * k + dx, :].reshape(1, 1, C)
            tapm = tap if mask is None else tap * mask        # (1, Ww, C)
            contrib = xr[dy:dy + Hh, :, :] * tapm             # cheap H slice
            acc = contrib if acc is None else acc + contrib   # init from 1st tap

    acc = acc + dw_b_ref[...].reshape(1, 1, C)
    u = (_gelu(acc) * s1_ref[...].reshape(1, 1, C)
         + t1_ref[...].reshape(1, 1, C) + x)          # depthwise block + residual

    # Pointwise (1x1) conv == GEMM on the flattened spatial axis.
    u2d = u.reshape(Hh * Ww, C)
    v = jnp.dot(u2d.astype(pw_w_ref.dtype), pw_w_ref[...],
                preferred_element_type=jnp.float32)
    v = v + pw_b_ref[0, :]
    v = _gelu(v) * s2_ref[0, :] + t2_ref[0, :]
    out = v + u2d                                     # pointwise block + residual
    o_ref[...] = out.reshape(Hh, Ww, C).astype(o_ref.dtype)

    if pool_ref:                                      # fused global avg-pool
        pool_ref[0][...] = jnp.mean(out, axis=0, keepdims=True)


def _head_kernel(p_ref, w_ref, b_ref, o_ref):
    # p_ref: (N, dim) f32 pooled features; tiny matmul, fully VMEM resident.
    o_ref[...] = (jnp.dot(p_ref[...].astype(w_ref.dtype), w_ref[...],
                          preferred_element_type=jnp.float32) + b_ref[0, :])


# ---------------------------------------------------------------------------
# pallas_call wrappers
# ---------------------------------------------------------------------------
def _patch_embed(patches, w, b, scale, shift, *, tm, dim, K):
    Mp = patches.shape[0]
    vec_spec = pl.BlockSpec((1, dim), lambda i: (0, 0))
    return pl.pallas_call(
        _patch_embed_kernel,
        out_shape=jax.ShapeDtypeStruct((Mp, dim), _ACT_DTYPE),
        grid=(Mp // tm,),
        in_specs=[pl.BlockSpec((tm, K), lambda i: (i, 0)),
                  pl.BlockSpec((K, dim), lambda i: (0, 0)),
                  vec_spec, vec_spec, vec_spec],
        out_specs=pl.BlockSpec((tm, dim), lambda i: (i, 0)),
        compiler_params=pltpu.CompilerParams(
            dimension_semantics=("parallel",),
            vmem_limit_bytes=_VMEM_LIMIT),
    )(patches, w, b, scale, shift)


def _mixer_layer(y, dw_w, dw_b, s1, t1, pw_w, pw_b, s2, t2, *, k, fuse_pool):
    N, Hp, Wp, dim = y.shape
    kernel = functools.partial(_mixer_layer_kernel, k=k)
    img_spec = pl.BlockSpec((None, Hp, Wp, dim), lambda b: (b, 0, 0, 0))
    vec_spec = pl.BlockSpec((1, dim), lambda b: (0, 0))

    out_shape = jax.ShapeDtypeStruct((N, Hp, Wp, dim), y.dtype)
    out_specs = img_spec
    if fuse_pool:
        out_shape = (out_shape,
                     jax.ShapeDtypeStruct((N, 1, dim), jnp.float32))
        out_specs = (img_spec,
                     pl.BlockSpec((None, 1, dim), lambda b: (b, 0, 0)))

    return pl.pallas_call(
        kernel,
        out_shape=out_shape,
        grid=(N,),
        in_specs=[img_spec,
                  pl.BlockSpec((k * k, dim), lambda b: (0, 0)),
                  vec_spec, vec_spec, vec_spec,
                  pl.BlockSpec((dim, dim), lambda b: (0, 0)),
                  vec_spec, vec_spec, vec_spec],
        out_specs=out_specs,
        input_output_aliases={0: 0},       # residual layer: in-place friendly
        compiler_params=pltpu.CompilerParams(
            dimension_semantics=("parallel",),
            vmem_limit_bytes=_VMEM_LIMIT),
    )(y, dw_w, dw_b, s1, t1, pw_w, pw_b, s2, t2)


def _head(pooled, w, b):
    N, dim = pooled.shape
    num_classes = w.shape[1]
    return pl.pallas_call(
        _head_kernel,
        out_shape=jax.ShapeDtypeStruct((N, num_classes), jnp.float32),
        in_specs=[pl.BlockSpec(memory_space=pltpu.MemorySpace.VMEM)] * 3,
        out_specs=pl.BlockSpec(memory_space=pltpu.MemorySpace.VMEM),
    )(pooled, w, b)


# ---------------------------------------------------------------------------
# One-time weight packing (done OUTSIDE the per-step jitted forward)
# ---------------------------------------------------------------------------
def prepack_params(params, *, dim, kernel_size, patch_size, num_classes):
    vec = lambda v: v.reshape(1, dim).astype(jnp.float32)
    pe = params["patch_embed"]
    s0, t0 = _bn_fold(pe["bn"])
    packed = dict(
        pe_w=pe["w"].reshape(dim, -1).T.astype(_ACT_DTYPE),   # (K, dim)
        pe_b=vec(pe["b"]), pe_s=vec(s0), pe_t=vec(t0),
        layers=[],
        lin_w=params["lin_w"].T.astype(_ACT_DTYPE),           # (dim, classes)
        lin_b=params["lin_b"].reshape(1, num_classes).astype(jnp.float32),
    )
    kk = kernel_size * kernel_size
    for layer in params["layers"]:
        s1, t1 = _bn_fold(layer["bn1"])
        s2, t2 = _bn_fold(layer["bn2"])
        packed["layers"].append(dict(
            dw_w=layer["dw_w"].reshape(dim, kk).T.astype(jnp.float32),  # (k*k, dim)
            dw_b=vec(layer["dw_b"]), s1=vec(s1), t1=vec(t1),
            pw_w=layer["pw_w"].reshape(dim, dim).T.astype(_ACT_DTYPE),  # (in, out)
            pw_b=vec(layer["pw_b"]), s2=vec(s2), t2=vec(t2)))
    return packed


# ---------------------------------------------------------------------------
# ConvMixer forward (Pallas)
# ---------------------------------------------------------------------------
def convmixer_forward(x, packed, dim, depth, kernel_size, patch_size,
                      num_classes):
    N, Cin, H, W = x.shape
    p = patch_size
    Hp, Wp = H // p, W // p
    M = N * Hp * Wp
    K = Cin * p * p

    # --- EmbeddingPatch: strided conv == patch extraction + GEMM ---
    # K stays un-padded (full-dim block axis is exempt from the 128-lane rule),
    # so no inflated LHS is materialized in HBM.
    patches = (x.reshape(N, Cin, Hp, p, Wp, p)
                 .transpose(0, 2, 4, 1, 3, 5)
                 .reshape(M, K)).astype(_ACT_DTYPE)

    if M >= 1024:
        tm = 1024
    elif M >= 512:
        tm = 512
    else:
        tm = _round_up(M, 16)            # bf16 sublane tile = 16
    Mp = _round_up(M, tm)
    if Mp != M:
        patches = jnp.pad(patches, ((0, Mp - M), (0, 0)))

    y2d = _patch_embed(patches, packed["pe_w"], packed["pe_b"],
                       packed["pe_s"], packed["pe_t"], tm=tm, dim=dim, K=K)
    y = y2d[:M].reshape(N, Hp, Wp, dim)          # NHWC, bf16

    # --- ConvMixer layers: one fused pallas_call each; the last layer also
    #     emits the fused global-average-pool output. ---
    pooled = None
    layers = packed["layers"]
    for li, layer in enumerate(layers):
        last = li == len(layers) - 1
        res = _mixer_layer(y, layer["dw_w"], layer["dw_b"], layer["s1"],
                           layer["t1"], layer["pw_w"], layer["pw_b"],
                           layer["s2"], layer["t2"],
                           k=kernel_size, fuse_pool=last)
        if last:
            y, pooled = res
        else:
            y = res

    if pooled is None:
        # TODO(synk): depth == 0 corner case — no layer to fuse the pool into;
        # pooled in plain JAX (not on any realistic ConvMixer path).
        pooled2d = y.reshape(N, Hp * Wp, dim).astype(jnp.float32).mean(axis=1)
    else:
        pooled2d = pooled.reshape(N, dim)

    # --- classifier: tiny (N, dim) x (dim, classes) matmul ---
    return _head(pooled2d, packed["lin_w"], packed["lin_b"])


# ---------------------------------------------------------------------------
# Pure-JAX reference (for verification)
# ---------------------------------------------------------------------------
def convmixer_reference(x, params, dim, depth, kernel_size, patch_size,
                        num_classes):
    def bn_nchw(v, b):
        scale, shift = _bn_fold(b)
        return v * scale[None, :, None, None] + shift[None, :, None, None]

    gelu = lambda v: jax.nn.gelu(v, approximate=False)
    pe = params["patch_embed"]
    y = jax.lax.conv_general_dilated(
        x, pe["w"], (patch_size, patch_size), "VALID",
        dimension_numbers=("NCHW", "OIHW", "NCHW"))
    y = y + pe["b"][None, :, None, None]
    y = bn_nchw(gelu(y), pe["bn"])
    for layer in params["layers"]:
        dw = jax.lax.conv_general_dilated(
            y, layer["dw_w"], (1, 1), "SAME",
            dimension_numbers=("NCHW", "OIHW", "NCHW"),
            feature_group_count=dim)
        dw = dw + layer["dw_b"][None, :, None, None]
        out = bn_nchw(gelu(dw), layer["bn1"]) + y
        pw = jnp.einsum("nchw,dc->ndhw", out, layer["pw_w"].reshape(dim, dim))
        pw = pw + layer["pw_b"][None, :, None, None]
        y = bn_nchw(gelu(pw), layer["bn2"]) + out
    pooled = y.mean(axis=(2, 3))
    return pooled @ params["lin_w"].T + params["lin_b"]


# ---------------------------------------------------------------------------
# deterministic parameter init
# ---------------------------------------------------------------------------
def init_params(key, dim, depth, kernel_size, patch_size, num_classes, in_ch=3):
    keys = iter(jax.random.split(key, 256))

    def nrm(shape, s=0.1):
        return s * jax.random.normal(next(keys), shape, jnp.float32)

    def bn_params():
        return dict(gamma=1.0 + nrm((dim,), 0.1),
                    beta=nrm((dim,), 0.05),
                    rm=nrm((dim,), 0.1),
                    rv=0.5 + 0.5 * jax.random.uniform(next(keys), (dim,),
                                                      jnp.float32))

    return dict(
        patch_embed=dict(w=nrm((dim, in_ch, patch_size, patch_size)),
                         b=nrm((dim,), 0.02),
                         bn=bn_params()),
        layers=[dict(dw_w=nrm((dim, 1, kernel_size, kernel_size)),
                     dw_b=nrm((dim,), 0.02),
                     bn1=bn_params(),
                     pw_w=nrm((dim, dim, 1, 1)),
                     pw_b=nrm((dim,), 0.02),
                     bn2=bn_params())
                for _ in range(depth)],
        lin_w=nrm((num_classes, dim)),
        lin_b=nrm((num_classes,), 0.02),
    )


if __name__ == "__main__":
    # dim is a multiple of 128 so the channel (lane) axis is dense.
    dim, depth, kernel_size, patch_size, num_classes = 128, 2, 3, 4, 10
    key = jax.random.PRNGKey(0)
    kx, kp = jax.random.split(key)
    x = jax.random.normal(kx, (2, 3, 32, 32), jnp.float32)   # NCHW, like PyTorch
    params = init_params(kp, dim, depth, kernel_size, patch_size, num_classes)

    # One-time weight packing, outside the jitted per-step forward.
    packed = prepack_params(params, dim=dim, kernel_size=kernel_size,
                            patch_size=patch_size, num_classes=num_classes)

    fwd = jax.jit(functools.partial(
        convmixer_forward, dim=dim, depth=depth, kernel_size=kernel_size,
        patch_size=patch_size, num_classes=num_classes))
    out = jax.block_until_ready(fwd(x, packed))

    ref = convmixer_reference(x, params, dim, depth, kernel_size, patch_size,
                              num_classes)

    assert out.shape == (2, num_classes)
    assert bool(jnp.all(jnp.isfinite(out)))
    # bf16 activation storage + tanh-GELU => slightly looser than pure-f32.
    assert bool(jnp.allclose(out, ref, atol=3e-2, rtol=3e-2)), (out, ref)
    print("KERNEL_OK")
</pallas_src>

<mosaic_0001>
module attributes {stable_mosaic.version = 11 : i64} {
  func.func @_patch_embed_kernel(%arg0: i32, %arg1: memref<128x48xbf16, #tpu.memory_space<vmem>>, %arg2: memref<48x128xbf16, #tpu.memory_space<vmem>>, %arg3: memref<1x128xf32, #tpu.memory_space<vmem>>, %arg4: memref<1x128xf32, #tpu.memory_space<vmem>>, %arg5: memref<1x128xf32, #tpu.memory_space<vmem>>, %arg6: memref<128x128xbf16, #tpu.memory_space<vmem>>) attributes {dimension_semantics = [#tpu.dimension_semantics<parallel>], iteration_bounds = array<i64: 1>, scalar_prefetch = 0 : i64, scratch_operands = 0 : i64, tpu.core_type = #tpu.core_type<tc>, window_params = [{transform_indices = @transform_0, window_bounds = array<i64: 128, 48>}, {pipeline_mode = #tpu.pipeline_mode<synchronous>, transform_indices = @transform_1, window_bounds = array<i64: 48, 128>}, {pipeline_mode = #tpu.pipeline_mode<synchronous>, transform_indices = @transform_2, window_bounds = array<i64: 1, 128>}, {pipeline_mode = #tpu.pipeline_mode<synchronous>, transform_indices = @transform_3, window_bounds = array<i64: 1, 128>}, {pipeline_mode = #tpu.pipeline_mode<synchronous>, transform_indices = @transform_4, window_bounds = array<i64: 1, 128>}, {transform_indices = @transform_5, window_bounds = array<i64: 128, 128>}]} {
    %c0 = arith.constant 0 : index
    %c0_0 = arith.constant 0 : index
    %0 = vector.load %arg1[%c0, %c0_0] : memref<128x48xbf16, #tpu.memory_space<vmem>>, vector<128x48xbf16>
    %c0_1 = arith.constant 0 : index
    %c0_2 = arith.constant 0 : index
    %1 = vector.load %arg2[%c0_1, %c0_2] : memref<48x128xbf16, #tpu.memory_space<vmem>>, vector<48x128xbf16>
    %cst = arith.constant dense<0.000000e+00> : vector<128x128xf32>
    %2 = tpu.matmul %0, %1, %cst {dimension_numbers = #tpu.dot_dimension_numbers<[1], [0], [0], [1], [0, 0, 1, 1], [], []>} : vector<128x48xbf16>, vector<48x128xbf16>, vector<128x128xf32> -> vector<128x128xf32>
    %c0_3 = arith.constant 0 : index
    %c0_4 = arith.constant 0 : index
    %3 = vector.load %arg3[%c0_3, %c0_4] : memref<1x128xf32, #tpu.memory_space<vmem>>, vector<1x128xf32>
    %4 = vector.shape_cast %3 : vector<1x128xf32> to vector<128xf32>
    %5 = vector.shape_cast %4 : vector<128xf32> to vector<1x128xf32>
    %6 = vector.broadcast %5 : vector<1x128xf32> to vector<128x128xf32>
    %7 = arith.addf %2, %6 : vector<128x128xf32>
    %cst_5 = arith.constant 5.000000e-01 : f32
    %8 = vector.broadcast %cst_5 : f32 to vector<128x128xf32>
    %9 = arith.mulf %8, %7 : vector<128x128xf32>
    %cst_6 = arith.constant 4.471500e-02 : f32
    %10 = vector.broadcast %cst_6 : f32 to vector<128x128xf32>
    %11 = arith.mulf %10, %7 : vector<128x128xf32>
    %12 = arith.mulf %11, %7 : vector<128x128xf32>
    %13 = arith.mulf %12, %7 : vector<128x128xf32>
    %14 = arith.addf %7, %13 : vector<128x128xf32>
    %cst_7 = arith.constant 0.797884583 : f32
    %15 = vector.broadcast %cst_7 : f32 to vector<128x128xf32>
    %16 = arith.mulf %15, %14 : vector<128x128xf32>
    %17 = math.tanh %16 : vector<128x128xf32>
    %cst_8 = arith.constant 1.000000e+00 : f32
    %18 = vector.broadcast %cst_8 : f32 to vector<128x128xf32>
    %19 = arith.addf %18, %17 : vector<128x128xf32>
    %20 = arith.mulf %9, %19 : vector<128x128xf32>
    %c0_9 = arith.constant 0 : index
    %c0_10 = arith.constant 0 : index
    %21 = vector.load %arg4[%c0_9, %c0_10] : memref<1x128xf32, #tpu.memory_space<vmem>>, vector<1x128xf32>
    %22 = vector.shape_cast %21 : vector<1x128xf32> to vector<128xf32>
    %23 = vector.shape_cast %22 : vector<128xf32> to vector<1x128xf32>
    %24 = vector.broadcast %23 : vector<1x128xf32> to vector<128x128xf32>
    %25 = arith.mulf %20, %24 : vector<128x128xf32>
    %c0_11 = arith.constant 0 : index
    %c0_12 = arith.constant 0 : index
    %26 = vector.load %arg5[%c0_11, %c0_12] : memref<1x128xf32, #tpu.memory_space<vmem>>, vector<1x128xf32>
    %27 = vector.shape_cast %26 : vector<1x128xf32> to vector<128xf32>
    %28 = vector.shape_cast %27 : vector<128xf32> to vector<1x128xf32>
    %29 = vector.broadcast %28 : vector<1x128xf32> to vector<128x128xf32>
    %30 = arith.addf %25, %29 : vector<128x128xf32>
    %31 = arith.truncf %30 : vector<128x128xf32> to vector<128x128xbf16>
    %c0_13 = arith.constant 0 : index
    %c0_14 = arith.constant 0 : index
    %32 = vector.load %arg6[%c0_13, %c0_14] : memref<128x128xbf16, #tpu.memory_space<vmem>>, vector<128x128xbf16>
    tpu.vector_store %arg6[%c0_13, %c0_14], %31 {strides = array<i32>} : memref<128x128xbf16, #tpu.memory_space<vmem>>, vector<128x128xbf16>,
    return
  }
  func.func @transform_0(%arg0: i32) -> (i32, i32) {
    %c0_i32 = arith.constant 0 : i32
    %c0_i32_0 = arith.constant 0 : i32
    return %arg0, %c0_i32 : i32, i32
  }
  func.func @transform_1(%arg0: i32) -> (i32, i32) {
    %c0_i32 = arith.constant 0 : i32
    %c0_i32_0 = arith.constant 0 : i32
    %c0_i32_1 = arith.constant 0 : i32
    return %c0_i32, %c0_i32_0 : i32, i32
  }
  func.func @transform_2(%arg0: i32) -> (i32, i32) {
    %c0_i32 = arith.constant 0 : i32
    %c0_i32_0 = arith.constant 0 : i32
    %c0_i32_1 = arith.constant 0 : i32
    return %c0_i32, %c0_i32_0 : i32, i32
  }
  func.func @transform_3(%arg0: i32) -> (i32, i32) {
    %c0_i32 = arith.constant 0 : i32
    %c0_i32_0 = arith.constant 0 : i32
    %c0_i32_1 = arith.constant 0 : i32
    return %c0_i32, %c0_i32_0 : i32, i32
  }
  func.func @transform_4(%arg0: i32) -> (i32, i32) {
    %c0_i32 = arith.constant 0 : i32
    %c0_i32_0 = arith.constant 0 : i32
    %c0_i32_1 = arith.constant 0 : i32
    return %c0_i32, %c0_i32_0 : i32, i32
  }
  func.func @transform_5(%arg0: i32) -> (i32, i32) {
    %c0_i32 = arith.constant 0 : i32
    %c0_i32_0 = arith.constant 0 : i32
    return %arg0, %c0_i32 : i32, i32
  }
}

module attributes {stable_mosaic.version = 11 : i64} {
  func.func @_mixer_layer_kernel(%arg0: i32, %arg1: memref<1x8x8x128xbf16, #tpu.memory_space<vmem>>, %arg2: memref<9x128xf32, #tpu.memory_space<vmem>>, %arg3: memref<1x128xf32, #tpu.memory_space<vmem>>, %arg4: memref<1x128xf32, #tpu.memory_space<vmem>>, %arg5: memref<1x128xf32, #tpu.memory_space<vmem>>, %arg6: memref<128x128xbf16, #tpu.memory_space<vmem>>, %arg7: memref<1x128xf32, #tpu.memory_space<vmem>>, %arg8: memref<1x128xf32, #tpu.memory_space<vmem>>, %arg9: memref<1x128xf32, #tpu.memory_space<vmem>>, %arg10: memref<1x8x8x128xbf16, #tpu.memory_space<vmem>>) attributes {dimension_semantics = [#tpu.dimension_semantics<parallel>], iteration_bounds = array<i64: 2>, scalar_prefetch = 0 : i64, scratch_operands = 0 : i64, tpu.core_type = #tpu.core_type<tc>, window_params = [{transform_indices = @transform_0, window_bounds = array<i64: 1, 8, 8, 128>}, {pipeline_mode = #tpu.pipeline_mode<synchronous>, transform_indices = @transform_1, window_bounds = array<i64: 9, 128>}, {pipeline_mode = #tpu.pipeline_mode<synchronous>, transform_indices = @transform_2, window_bounds = array<i64: 1, 128>}, {pipeline_mode = #tpu.pipeline_mode<synchronous>, transform_indices = @transform_3, window_bounds = array<i64: 1, 128>}, {pipeline_mode = #tpu.pipeline_mode<synchronous>, transform_indices = @transform_4, window_bounds = array<i64: 1, 128>}, {pipeline_mode = #tpu.pipeline_mode<synchronous>, transform_indices = @transform_5, window_bounds = array<i64: 128, 128>}, {pipeline_mode = #tpu.pipeline_mode<synchronous>, transform_indices = @transform_6, window_bounds = array<i64: 1, 128>}, {pipeline_mode = #tpu.pipeline_mode<synchronous>, transform_indices = @transform_7, window_bounds = array<i64: 1, 128>}, {pipeline_mode = #tpu.pipeline_mode<synchronous>, transform_indices = @transform_8, window_bounds = array<i64: 1, 128>}, {transform_indices = @transform_9, window_bounds = array<i64: 1, 8, 8, 128>}]} {
    %c0 = arith.constant 0 : index
    %c0_0 = arith.constant 0 : index
    %c0_1 = arith.constant 0 : index
    %c0_2 = arith.constant 0 : index
    %0 = vector.load %arg1[%c0, %c0_0, %c0_1, %c0_2] : memref<1x8x8x128xbf16, #tpu.memory_space<vmem>>, vector<1x8x8x128xbf16>
    %1 = vector.shape_cast %0 : vector<1x8x8x128xbf16> to vector<8x8x128xbf16>
    %2 = arith.extf %1 : vector<8x8x128xbf16> to vector<8x8x128xf32>
    %c0_3 = arith.constant 0 : index
    %c0_4 = arith.constant 0 : index
    %3 = vector.load %arg2[%c0_3, %c0_4] : memref<9x128xf32, #tpu.memory_space<vmem>>, vector<9x128xf32>
    %cst = arith.constant 0.000000e+00 : f32
    %4 = vector.broadcast %cst : f32 to vector<1x8x128xf32>
    %5 = tpu.concatenate %4, %2, %4 in 0 : vector<1x8x128xf32>, vector<8x8x128xf32>, vector<1x8x128xf32> -> vector<10x8x128xf32>
    %6 = tpu.iota {dimensions = array<i32: 1>} : vector<1x8x128xi32>
    %c1_i32 = arith.constant 1 : i32
    %7 = tpu.dynamic_rotate %5 by %c1_i32 dim 1 : vector<10x8x128xf32>, i32 -> vector<10x8x128xf32>
    %c-1_i32 = arith.constant -1 : i32
    %8 = vector.broadcast %c-1_i32 : i32 to vector<1x8x128xi32>
    %9 = arith.addi %6, %8 : vector<1x8x128xi32>
    %c0_i32 = arith.constant 0 : i32
    %10 = vector.broadcast %c0_i32 : i32 to vector<1x8x128xi32>
    %11 = arith.cmpi sge, %9, %10 : vector<1x8x128xi32>
    %c-1_i32_5 = arith.constant -1 : i32
    %12 = vector.broadcast %c-1_i32_5 : i32 to vector<1x8x128xi32>
    %13 = arith.addi %6, %12 : vector<1x8x128xi32>
    %c8_i32 = arith.constant 8 : i32
    %14 = vector.broadcast %c8_i32 : i32 to vector<1x8x128xi32>
    %15 = arith.cmpi slt, %13, %14 : vector<1x8x128xi32>
    %16 = arith.andi %11, %15 : vector<1x8x128xi1>
    %17 = arith.extui %16 : vector<1x8x128xi1> to vector<1x8x128xi32>
    %18 = arith.sitofp %17 : vector<1x8x128xi32> to vector<1x8x128xf32>
    %19 = vector.extract_strided_slice %3 {offsets = [0, 0], sizes = [1, 128], strides = [1, 1]} : vector<9x128xf32> to vector<1x128xf32>
    %20 = vector.shape_cast %19 : vector<1x128xf32> to vector<128xf32>
    %21 = vector.shape_cast %20 : vector<128xf32> to vector<1x1x128xf32>
    %22 = vector.broadcast %21 : vector<1x1x128xf32> to vector<1x8x128xf32>
    %23 = arith.mulf %22, %18 : vector<1x8x128xf32>
    %24 = vector.extract_strided_slice %7 {offsets = [0, 0, 0], sizes = [8, 8, 128], strides = [1, 1, 1]} : vector<10x8x128xf32> to vector<8x8x128xf32>
    %25 = vector.broadcast %23 : vector<1x8x128xf32> to vector<8x8x128xf32>
    %26 = arith.mulf %24, %25 : vector<8x8x128xf32>
    %27 = vector.extract_strided_slice %3 {offsets = [3, 0], sizes = [1, 128], strides = [1, 1]} : vector<9x128xf32> to vector<1x128xf32>
    %28 = vector.shape_cast %27 : vector<1x128xf32> to vector<128xf32>
    %29 = vector.shape_cast %28 : vector<128xf32> to vector<1x1x128xf32>
    %30 = vector.broadcast %29 : vector<1x1x128xf32> to vector<1x8x128xf32>
    %31 = arith.mulf %30, %18 : vector<1x8x128xf32>
    %32 = vector.extract_strided_slice %7 {offsets = [1, 0, 0], sizes = [8, 8, 128], strides = [1, 1, 1]} : vector<10x8x128xf32> to vector<8x8x128xf32>
    %33 = vector.broadcast %31 : vector<1x8x128xf32> to vector<8x8x128xf32>
    %34 = arith.mulf %32, %33 : vector<8x8x128xf32>
    %35 = arith.addf %26, %34 : vector<8x8x128xf32>
    %36 = vector.extract_strided_slice %3 {offsets = [6, 0], sizes = [1, 128], strides = [1, 1]} : vector<9x128xf32> to vector<1x128xf32>
    %37 = vector.shape_cast %36 : vector<1x128xf32> to vector<128xf32>
    %38 = vector.shape_cast %37 : vector<128xf32> to vector<1x1x128xf32>
    %39 = vector.broadcast %38 : vector<1x1x128xf32> to vector<1x8x128xf32>
    %40 = arith.mulf %39, %18 : vector<1x8x128xf32>
    %41 = vector.extract_strided_slice %7 {offsets = [2, 0, 0], sizes = [8, 8, 128], strides = [1, 1, 1]} : vector<10x8x128xf32> to vector<8x8x128xf32>
    %42 = vector.broadcast %40 : vector<1x8x128xf32> to vector<8x8x128xf32>
    %43 = arith.mulf %41, %42 : vector<8x8x128xf32>
    %44 = arith.addf %35, %43 : vector<8x8x128xf32>
    %45 = vector.extract_strided_slice %3 {offsets = [1, 0], sizes = [1, 128], strides = [1, 1]} : vector<9x128xf32> to vector<1x128xf32>
    %46 = vector.shape_cast %45 : vector<1x128xf32> to vector<128xf32>
    %47 = vector.shape_cast %46 : vector<128xf32> to vector<1x1x128xf32>
    %48 = vector.extract_strided_slice %5 {offsets = [0, 0, 0], sizes = [8, 8, 128], strides = [1, 1, 1]} : vector<10x8x128xf32> to vector<8x8x128xf32>
    %49 = vector.broadcast %47 : vector<1x1x128xf32> to vector<8x8x128xf32>
    %50 = arith.mulf %48, %49 : vector<8x8x128xf32>
    %51 = arith.addf %44, %50 : vector<8x8x128xf32>
    %52 = vector.extract_strided_slice %3 {offsets = [4, 0], sizes = [1, 128], strides = [1, 1]} : vector<9x128xf32> to vector<1x128xf32>
    %53 = vector.shape_cast %52 : vector<1x128xf32> to vector<128xf32>
    %54 = vector.shape_cast %53 : vector<128xf32> to vector<1x1x128xf32>
    %55 = vector.extract_strided_slice %5 {offsets = [1, 0, 0], sizes = [8, 8, 128], strides = [1, 1, 1]} : vector<10x8x128xf32> to vector<8x8x128xf32>
    %56 = vector.broadcast %54 : vector<1x1x128xf32> to vector<8x8x128xf32>
    %57 = arith.mulf %55, %56 : vector<8x8x128xf32>
    %58 = arith.addf %51, %57 : vector<8x8x128xf32>
    %59 = vector.extract_strided_slice %3 {offsets = [7, 0], sizes = [1, 128], strides = [1, 1]} : vector<9x128xf32> to vector<1x128xf32>
    %60 = vector.shape_cast %59 : vector<1x128xf32> to vector<128xf32>
    %61 = vector.shape_cast %60 : vector<128xf32> to vector<1x1x128xf32>
    %62 = vector.extract_strided_slice %5 {offsets = [2, 0, 0], sizes = [8, 8, 128], strides = [1, 1, 1]} : vector<10x8x128xf32> to vector<8x8x128xf32>
    %63 = vector.broadcast %61 : vector<1x1x128xf32> to vector<8x8x128xf32>
    %64 = arith.mulf %62, %63 : vector<8x8x128xf32>
    %65 = arith.addf %58, %64 : vector<8x8x128xf32>
    %c7_i32 = arith.constant 7 : i32
    %66 = tpu.dynamic_rotate %5 by %c7_i32 dim 1 : vector<10x8x128xf32>, i32 -> vector<10x8x128xf32>
    %c1_i32_6 = arith.constant 1 : i32
    %67 = vector.broadcast %c1_i32_6 : i32 to vector<1x8x128xi32>
    %68 = arith.addi %6, %67 : vector<1x8x128xi32>
    %c0_i32_7 = arith.constant 0 : i32
    %69 = vector.broadcast %c0_i32_7 : i32 to vector<1x8x128xi32>
    %70 = arith.cmpi sge, %68, %69 : vector<1x8x128xi32>
    %c1_i32_8 = arith.constant 1 : i32
    %71 = vector.broadcast %c1_i32_8 : i32 to vector<1x8x128xi32>
    %72 = arith.addi %6, %71 : vector<1x8x128xi32>
    %c8_i32_9 = arith.constant 8 : i32
    %73 = vector.broadcast %c8_i32_9 : i32 to vector<1x8x128xi32>
    %74 = arith.cmpi slt, %72, %73 : vector<1x8x128xi32>
    %75 = arith.andi %70, %74 : vector<1x8x128xi1>
    %76 = arith.extui %75 : vector<1x8x128xi1> to vector<1x8x128xi32>
    %77 = arith.sitofp %76 : vector<1x8x128xi32> to vector<1x8x128xf32>
    %78 = vector.extract_strided_slice %3 {offsets = [2, 0], sizes = [1, 128], strides = [1, 1]} : vector<9x128xf32> to vector<1x128xf32>
    %79 = vector.shape_cast %78 : vector<1x128xf32> to vector<128xf32>
    %80 = vector.shape_cast %79 : vector<128xf32> to vector<1x1x128xf32>
    %81 = vector.broadcast %80 : vector<1x1x128xf32> to vector<1x8x128xf32>
    %82 = arith.mulf %81, %77 : vector<1x8x128xf32>
    %83 = vector.extract_strided_slice %66 {offsets = [0, 0, 0], sizes = [8, 8, 128], strides = [1, 1, 1]} : vector<10x8x128xf32> to vector<8x8x128xf32>
    %84 = vector.broadcast %82 : vector<1x8x128xf32> to vector<8x8x128xf32>
    %85 = arith.mulf %83, %84 : vector<8x8x128xf32>
    %86 = arith.addf %65, %85 : vector<8x8x128xf32>
    %87 = vector.extract_strided_slice %3 {offsets = [5, 0], sizes = [1, 128], strides = [1, 1]} : vector<9x128xf32> to vector<1x128xf32>
    %88 = vector.shape_cast %87 : vector<1x128xf32> to vector<128xf32>
    %89 = vector.shape_cast %88 : vector<128xf32> to vector<1x1x128xf32>
    %90 = vector.broadcast %89 : vector<1x1x128xf32> to vector<1x8x128xf32>
    %91 = arith.mulf %90, %77 : vector<1x8x128xf32>
    %92 = vector.extract_strided_slice %66 {offsets = [1, 0, 0], sizes = [8, 8, 128], strides = [1, 1, 1]} : vector<10x8x128xf32> to vector<8x8x128xf32>
    %93 = vector.broadcast %91 : vector<1x8x128xf32> to vector<8x8x128xf32>
    %94 = arith.mulf %92, %93 : vector<8x8x128xf32>
    %95 = arith.addf %86, %94 : vector<8x8x128xf32>
    %96 = vector.extract_strided_slice %3 {offsets = [8, 0], sizes = [1, 128], strides = [1, 1]} : vector<9x128xf32> to vector<1x128xf32>
    %97 = vector.shape_cast %96 : vector<1x128xf32> to vector<128xf32>
    %98 = vector.shape_cast %97 : vector<128xf32> to vector<1x1x128xf32>
    %99 = vector.broadcast %98 : vector<1x1x128xf32> to vector<1x8x128xf32>
    %100 = arith.mulf %99, %77 : vector<1x8x128xf32>
    %101 = vector.extract_strided_slice %66 {offsets = [2, 0, 0], sizes = [8, 8, 128], strides = [1, 1, 1]} : vector<10x8x128xf32> to vector<8x8x128xf32>
    %102 = vector.broadcast %100 : vector<1x8x128xf32> to vector<8x8x128xf32>
    %103 = arith.mulf %101, %102 : vector<8x8x128xf32>
    %104 = arith.addf %95, %103 : vector<8x8x128xf32>
    %c0_10 = arith.constant 0 : index
    %c0_11 = arith.constant 0 : index
    %105 = vector.load %arg3[%c0_10, %c0_11] : memref<1x128xf32, #tpu.memory_space<vmem>>, vector<1x128xf32>
    %106 = vector.shape_cast %105 : vector<1x128xf32> to vector<1x1x128xf32>
    %107 = vector.broadcast %106 : vector<1x1x128xf32> to vector<8x8x128xf32>
    %108 = arith.addf %104, %107 : vector<8x8x128xf32>
    %cst_12 = arith.constant 5.000000e-01 : f32
    %109 = vector.broadcast %cst_12 : f32 to vector<8x8x128xf32>
    %110 = arith.mulf %109, %108 : vector<8x8x128xf32>
    %cst_13 = arith.constant 4.471500e-02 : f32
    %111 = vector.broadcast %cst_13 : f32 to vector<8x8x128xf32>
    %112 = arith.mulf %111, %108 : vector<8x8x128xf32>
    %113 = arith.mulf %112, %108 : vector<8x8x128xf32>
    %114 = arith.mulf %113, %108 : vector<8x8x128xf32>
    %115 = arith.addf %108, %114 : vector<8x8x128xf32>
    %cst_14 = arith.constant 0.797884583 : f32
    %116 = vector.broadcast %cst_14 : f32 to vector<8x8x128xf32>
    %117 = arith.mulf %116, %115 : vector<8x8x128xf32>
    %118 = math.tanh %117 : vector<8x8x128xf32>
    %cst_15 = arith.constant 1.000000e+00 : f32
    %119 = vector.broadcast %cst_15 : f32 to vector<8x8x128xf32>
    %120 = arith.addf %119, %118 : vector<8x8x128xf32>
    %121 = arith.mulf %110, %120 : vector<8x8x128xf32>
    %c0_16 = arith.constant 0 : index
    %c0_17 = arith.constant 0 : index
    %122 = vector.load %arg4[%c0_16, %c0_17] : memref<1x128xf32, #tpu.memory_space<vmem>>, vector<1x128xf32>
    %123 = vector.shape_cast %122 : vector<1x128xf32> to vector<1x1x128xf32>
    %124 = vector.broadcast %123 : vector<1x1x128xf32> to vector<8x8x128xf32>
    %125 = arith.mulf %121, %124 : vector<8x8x128xf32>
    %c0_18 = arith.constant 0 : index
    %c0_19 = arith.constant 0 : index
    %126 = vector.load %arg5[%c0_18, %c0_19] : memref<1x128xf32, #tpu.memory_space<vmem>>, vector<1x128xf32>
    %127 = vector.shape_cast %126 : vector<1x128xf32> to vector<1x1x128xf32>
    %128 = vector.broadcast %127 : vector<1x1x128xf32> to vector<8x8x128xf32>
    %129 = arith.addf %125, %128 : vector<8x8x128xf32>
    %130 = arith.addf %129, %2 : vector<8x8x128xf32>
    %131 = vector.shape_cast %130 : vector<8x8x128xf32> to vector<64x128xf32>
    %132 = arith.truncf %131 : vector<64x128xf32> to vector<64x128xbf16>
    %c0_20 = arith.constant 0 : index
    %c0_21 = arith.constant 0 : index
    %133 = vector.load %arg6[%c0_20, %c0_21] : memref<128x128xbf16, #tpu.memory_space<vmem>>, vector<128x128xbf16>
    %cst_22 = arith.constant dense<0.000000e+00> : vector<64x128xf32>
    %134 = tpu.matmul %132, %133, %cst_22 {dimension_numbers = #tpu.dot_dimension_numbers<[1], [0], [0], [1], [0, 0, 1, 1], [], []>} : vector<64x128xbf16>, vector<128x128xbf16>, vector<64x128xf32> -> vector<64x128xf32>
    %c0_23 = arith.constant 0 : index
    %c0_24 = arith.constant 0 : index
    %135 = vector.load %arg7[%c0_23, %c0_24] : memref<1x128xf32, #tpu.memory_space<vmem>>, vector<1x128xf32>
    %136 = vector.shape_cast %135 : vector<1x128xf32> to vector<128xf32>
    %137 = vector.shape_cast %136 : vector<128xf32> to vector<1x128xf32>
    %138 = vector.broadcast %137 : vector<1x128xf32> to vector<64x128xf32>
    %139 = arith.addf %134, %138 : vector<64x128xf32>
    %cst_25 = arith.constant 5.000000e-01 : f32
    %140 = vector.broadcast %cst_25 : f32 to vector<64x128xf32>
    %141 = arith.mulf %140, %139 : vector<64x128xf32>
    %cst_26 = arith.constant 4.471500e-02 : f32
    %142 = vector.broadcast %cst_26 : f32 to vector<64x128xf32>
    %143 = arith.mulf %142, %139 : vector<64x128xf32>
    %144 = arith.mulf %143, %139 : vector<64x128xf32>
    %145 = arith.mulf %144, %139 : vector<64x128xf32>
    %146 = arith.addf %139, %145 : vector<64x128xf32>
    %cst_27 = arith.constant 0.797884583 : f32
    %147 = vector.broadcast %cst_27 : f32 to vector<64x128xf32>
    %148 = arith.mulf %147, %146 : vector<64x128xf32>
    %149 = math.tanh %148 : vector<64x128xf32>
    %cst_28 = arith.constant 1.000000e+00 : f32
    %150 = vector.broadcast %cst_28 : f32 to vector<64x128xf32>
    %151 = arith.addf %150, %149 : vector<64x128xf32>
    %152 = arith.mulf %141, %151 : vector<64x128xf32>
    %c0_29 = arith.constant 0 : index
    %c0_30 = arith.constant 0 : index
    %153 = vector.load %arg8[%c0_29, %c0_30] : memref<1x128xf32, #tpu.memory_space<vmem>>, vector<1x128xf32>
    %154 = vector.shape_cast %153 : vector<1x128xf32> to vector<128xf32>
    %155 = vector.shape_cast %154 : vector<128xf32> to vector<1x128xf32>
    %156 = vector.broadcast %155 : vector<1x128xf32> to vector<64x128xf32>
    %157 = arith.mulf %152, %156 : vector<64x128xf32>
    %c0_31 = arith.constant 0 : index
    %c0_32 = arith.constant 0 : index
    %158 = vector.load %arg9[%c0_31, %c0_32] : memref<1x128xf32, #tpu.memory_space<vmem>>, vector<1x128xf32>
    %159 = vector.shape_cast %158 : vector<1x128xf32> to vector<128xf32>
    %160 = vector.shape_cast %159 : vector<128xf32> to vector<1x128xf32>
    %161 = vector.broadcast %160 : vector<1x128xf32> to vector<64x128xf32>
    %162 = arith.addf %157, %161 : vector<64x128xf32>
    %163 = arith.addf %162, %131 : vector<64x128xf32>
    %164 = vector.shape_cast %163 : vector<64x128xf32> to vector<8x8x128xf32>
    %165 = arith.truncf %164 : vector<8x8x128xf32> to vector<8x8x128xbf16>
    %c0_33 = arith.constant 0 : index
    %c0_34 = arith.constant 0 : index
    %c0_35 = arith.constant 0 : index
    %c0_36 = arith.constant 0 : index
    %166 = vector.load %arg10[%c0_33, %c0_34, %c0_35, %c0_36] : memref<1x8x8x128xbf16, #tpu.memory_space<vmem>>, vector<1x8x8x128xbf16>
    %167 = vector.shape_cast %166 : vector<1x8x8x128xbf16> to vector<8x8x128xbf16>
    %168 = vector.shape_cast %165 : vector<8x8x128xbf16> to vector<1x8x8x128xbf16>
    tpu.vector_store %arg10[%c0_33, %c0_34, %c0_35, %c0_36], %168 {strides = array<i32>} : memref<1x8x8x128xbf16, #tpu.memory_space<vmem>>, vector<1x8x8x128xbf16>,
    return
  }
  func.func @transform_0(%arg0: i32) -> (i32, i32, i32, i32) {
    %c0_i32 = arith.constant 0 : i32
    %c0_i32_0 = arith.constant 0 : i32
    %c0_i32_1 = arith.constant 0 : i32
    %c0_i32_2 = arith.constant 0 : i32
    return %arg0, %c0_i32, %c0_i32_0, %c0_i32_1 : i32, i32, i32, i32
  }
  func.func @transform_1(%arg0: i32) -> (i32, i32) {
    %c0_i32 = arith.constant 0 : i32
    %c0_i32_0 = arith.constant 0 : i32
    %c0_i32_1 = arith.constant 0 : i32
    return %c0_i32, %c0_i32_0 : i32, i32
  }
  func.func @transform_2(%arg0: i32) -> (i32, i32) {
    %c0_i32 = arith.constant 0 : i32
    %c0_i32_0 = arith.constant 0 : i32
    %c0_i32_1 = arith.constant 0 : i32
    return %c0_i32, %c0_i32_0 : i32, i32
  }
  func.func @transform_3(%arg0: i32) -> (i32, i32) {
    %c0_i32 = arith.constant 0 : i32
    %c0_i32_0 = arith.constant 0 : i32
    %c0_i32_1 = arith.constant 0 : i32
    return %c0_i32, %c0_i32_0 : i32, i32
  }
  func.func @transform_4(%arg0: i32) -> (i32, i32) {
    %c0_i32 = arith.constant 0 : i32
    %c0_i32_0 = arith.constant 0 : i32
    %c0_i32_1 = arith.constant 0 : i32
    return %c0_i32, %c0_i32_0 : i32, i32
  }
  func.func @transform_5(%arg0: i32) -> (i32, i32) {
    %c0_i32 = arith.constant 0 : i32
    %c0_i32_0 = arith.constant 0 : i32
    %c0_i32_1 = arith.constant 0 : i32
    return %c0_i32, %c0_i32_0 : i32, i32
  }
  func.func @transform_6(%arg0: i32) -> (i32, i32) {
    %c0_i32 = arith.constant 0 : i32
    %c0_i32_0 = arith.constant 0 : i32
    %c0_i32_1 = arith.constant 0 : i32
    return %c0_i32, %c0_i32_0 : i32, i32
  }
  func.func @transform_7(%arg0: i32) -> (i32, i32) {
    %c0_i32 = arith.constant 0 : i32
    %c0_i32_0 = arith.constant 0 : i32
    %c0_i32_1 = arith.constant 0 : i32
    return %c0_i32, %c0_i32_0 : i32, i32
  }
  func.func @transform_8(%arg0: i32) -> (i32, i32) {
    %c0_i32 = arith.constant 0 : i32
    %c0_i32_0 = arith.constant 0 : i32
    %c0_i32_1 = arith.constant 0 : i32
    return %c0_i32, %c0_i32_0 : i32, i32
  }
  func.func @transform_9(%arg0: i32) -> (i32, i32, i32, i32) {
    %c0_i32 = arith.constant 0 : i32
    %c0_i32_0 = arith.constant 0 : i32
    %c0_i32_1 = arith.constant 0 : i32
    %c0_i32_2 = arith.constant 0 : i32
    return %arg0, %c0_i32, %c0_i32_0, %c0_i32_1 : i32, i32, i32, i32
  }
}

module attributes {stable_mosaic.version = 11 : i64} {
  func.func @_mixer_layer_kernel(%arg0: i32, %arg1: memref<1x8x8x128xbf16, #tpu.memory_space<vmem>>, %arg2: memref<9x128xf32, #tpu.memory_space<vmem>>, %arg3: memref<1x128xf32, #tpu.memory_space<vmem>>, %arg4: memref<1x128xf32, #tpu.memory_space<vmem>>, %arg5: memref<1x128xf32, #tpu.memory_space<vmem>>, %arg6: memref<128x128xbf16, #tpu.memory_space<vmem>>, %arg7: memref<1x128xf32, #tpu.memory_space<vmem>>, %arg8: memref<1x128xf32, #tpu.memory_space<vmem>>, %arg9: memref<1x128xf32, #tpu.memory_space<vmem>>, %arg10: memref<1x8x8x128xbf16, #tpu.memory_space<vmem>>, %arg11: memref<1x1x128xf32, #tpu.memory_space<vmem>>) attributes {dimension_semantics = [#tpu.dimension_semantics<parallel>], iteration_bounds = array<i64: 2>, scalar_prefetch = 0 : i64, scratch_operands = 0 : i64, tpu.core_type = #tpu.core_type<tc>, window_params = [{transform_indices = @transform_0, window_bounds = array<i64: 1, 8, 8, 128>}, {pipeline_mode = #tpu.pipeline_mode<synchronous>, transform_indices = @transform_1, window_bounds = array<i64: 9, 128>}, {pipeline_mode = #tpu.pipeline_mode<synchronous>, transform_indices = @transform_2, window_bounds = array<i64: 1, 128>}, {pipeline_mode = #tpu.pipeline_mode<synchronous>, transform_indices = @transform_3, window_bounds = array<i64: 1, 128>}, {pipeline_mode = #tpu.pipeline_mode<synchronous>, transform_indices = @transform_4, window_bounds = array<i64: 1, 128>}, {pipeline_mode = #tpu.pipeline_mode<synchronous>, transform_indices = @transform_5, window_bounds = array<i64: 128, 128>}, {pipeline_mode = #tpu.pipeline_mode<synchronous>, transform_indices = @transform_6, window_bounds = array<i64: 1, 128>}, {pipeline_mode = #tpu.pipeline_mode<synchronous>, transform_indices = @transform_7, window_bounds = array<i64: 1, 128>}, {pipeline_mode = #tpu.pipeline_mode<synchronous>, transform_indices = @transform_8, window_bounds = array<i64: 1, 128>}, {transform_indices = @transform_9, window_bounds = array<i64: 1, 8, 8, 128>}, {transform_indices = @transform_10, window_bounds = array<i64: 1, 1, 128>}]} {
    %c0 = arith.constant 0 : index
    %c0_0 = arith.constant 0 : index
    %c0_1 = arith.constant 0 : index
    %c0_2 = arith.constant 0 : index
    %0 = vector.load %arg1[%c0, %c0_0, %c0_1, %c0_2] : memref<1x8x8x128xbf16, #tpu.memory_space<vmem>>, vector<1x8x8x128xbf16>
    %1 = vector.shape_cast %0 : vector<1x8x8x128xbf16> to vector<8x8x128xbf16>
    %2 = arith.extf %1 : vector<8x8x128xbf16> to vector<8x8x128xf32>
    %c0_3 = arith.constant 0 : index
    %c0_4 = arith.constant 0 : index
    %3 = vector.load %arg2[%c0_3, %c0_4] : memref<9x128xf32, #tpu.memory_space<vmem>>, vector<9x128xf32>
    %cst = arith.constant 0.000000e+00 : f32
    %4 = vector.broadcast %cst : f32 to vector<1x8x128xf32>
    %5 = tpu.concatenate %4, %2, %4 in 0 : vector<1x8x128xf32>, vector<8x8x128xf32>, vector<1x8x128xf32> -> vector<10x8x128xf32>
    %6 = tpu.iota {dimensions = array<i32: 1>} : vector<1x8x128xi32>
    %c1_i32 = arith.constant 1 : i32
    %7 = tpu.dynamic_rotate %5 by %c1_i32 dim 1 : vector<10x8x128xf32>, i32 -> vector<10x8x128xf32>
    %c-1_i32 = arith.constant -1 : i32
    %8 = vector.broadcast %c-1_i32 : i32 to vector<1x8x128xi32>
    %9 = arith.addi %6, %8 : vector<1x8x128xi32>
    %c0_i32 = arith.constant 0 : i32
    %10 = vector.broadcast %c0_i32 : i32 to vector<1x8x128xi32>
    %11 = arith.cmpi sge, %9, %10 : vector<1x8x128xi32>
    %c-1_i32_5 = arith.constant -1 : i32
    %12 = vector.broadcast %c-1_i32_5 : i32 to vector<1x8x128xi32>
    %13 = arith.addi %6, %12 : vector<1x8x128xi32>
    %c8_i32 = arith.constant 8 : i32
    %14 = vector.broadcast %c8_i32 : i32 to vector<1x8x128xi32>
    %15 = arith.cmpi slt, %13, %14 : vector<1x8x128xi32>
    %16 = arith.andi %11, %15 : vector<1x8x128xi1>
    %17 = arith.extui %16 : vector<1x8x128xi1> to vector<1x8x128xi32>
    %18 = arith.sitofp %17 : vector<1x8x128xi32> to vector<1x8x128xf32>
    %19 = vector.extract_strided_slice %3 {offsets = [0, 0], sizes = [1, 128], strides = [1, 1]} : vector<9x128xf32> to vector<1x128xf32>
    %20 = vector.shape_cast %19 : vector<1x128xf32> to vector<128xf32>
    %21 = vector.shape_cast %20 : vector<128xf32> to vector<1x1x128xf32>
    %22 = vector.broadcast %21 : vector<1x1x128xf32> to vector<1x8x128xf32>
    %23 = arith.mulf %22, %18 : vector<1x8x128xf32>
    %24 = vector.extract_strided_slice %7 {offsets = [0, 0, 0], sizes = [8, 8, 128], strides = [1, 1, 1]} : vector<10x8x128xf32> to vector<8x8x128xf32>
    %25 = vector.broadcast %23 : vector<1x8x128xf32> to vector<8x8x128xf32>
    %26 = arith.mulf %24, %25 : vector<8x8x128xf32>
    %27 = vector.extract_strided_slice %3 {offsets = [3, 0], sizes = [1, 128], strides = [1, 1]} : vector<9x128xf32> to vector<1x128xf32>
    %28 = vector.shape_cast %27 : vector<1x128xf32> to vector<128xf32>
    %29 = vector.shape_cast %28 : vector<128xf32> to vector<1x1x128xf32>
    %30 = vector.broadcast %29 : vector<1x1x128xf32> to vector<1x8x128xf32>
    %31 = arith.mulf %30, %18 : vector<1x8x128xf32>
    %32 = vector.extract_strided_slice %7 {offsets = [1, 0, 0], sizes = [8, 8, 128], strides = [1, 1, 1]} : vector<10x8x128xf32> to vector<8x8x128xf32>
    %33 = vector.broadcast %31 : vector<1x8x128xf32> to vector<8x8x128xf32>
    %34 = arith.mulf %32, %33 : vector<8x8x128xf32>
    %35 = arith.addf %26, %34 : vector<8x8x128xf32>
    %36 = vector.extract_strided_slice %3 {offsets = [6, 0], sizes = [1, 128], strides = [1, 1]} : vector<9x128xf32> to vector<1x128xf32>
    %37 = vector.shape_cast %36 : vector<1x128xf32> to vector<128xf32>
    %38 = vector.shape_cast %37 : vector<128xf32> to vector<1x1x128xf32>
    %39 = vector.broadcast %38 : vector<1x1x128xf32> to vector<1x8x128xf32>
    %40 = arith.mulf %39, %18 : vector<1x8x128xf32>
    %41 = vector.extract_strided_slice %7 {offsets = [2, 0, 0], sizes = [8, 8, 128], strides = [1, 1, 1]} : vector<10x8x128xf32> to vector<8x8x128xf32>
    %42 = vector.broadcast %40 : vector<1x8x128xf32> to vector<8x8x128xf32>
    %43 = arith.mulf %41, %42 : vector<8x8x128xf32>
    %44 = arith.addf %35, %43 : vector<8x8x128xf32>
    %45 = vector.extract_strided_slice %3 {offsets = [1, 0], sizes = [1, 128], strides = [1, 1]} : vector<9x128xf32> to vector<1x128xf32>
    %46 = vector.shape_cast %45 : vector<1x128xf32> to vector<128xf32>
    %47 = vector.shape_cast %46 : vector<128xf32> to vector<1x1x128xf32>
    %48 = vector.extract_strided_slice %5 {offsets = [0, 0, 0], sizes = [8, 8, 128], strides = [1, 1, 1]} : vector<10x8x128xf32> to vector<8x8x128xf32>
    %49 = vector.broadcast %47 : vector<1x1x128xf32> to vector<8x8x128xf32>
    %50 = arith.mulf %48, %49 : vector<8x8x128xf32>
    %51 = arith.addf %44, %50 : vector<8x8x128xf32>
    %52 = vector.extract_strided_slice %3 {offsets = [4, 0], sizes = [1, 128], strides = [1, 1]} : vector<9x128xf32> to vector<1x128xf32>
    %53 = vector.shape_cast %52 : vector<1x128xf32> to vector<128xf32>
    %54 = vector.shape_cast %53 : vector<128xf32> to vector<1x1x128xf32>
    %55 = vector.extract_strided_slice %5 {offsets = [1, 0, 0], sizes = [8, 8, 128], strides = [1, 1, 1]} : vector<10x8x128xf32> to vector<8x8x128xf32>
    %56 = vector.broadcast %54 : vector<1x1x128xf32> to vector<8x8x128xf32>
    %57 = arith.mulf %55, %56 : vector<8x8x128xf32>
    %58 = arith.addf %51, %57 : vector<8x8x128xf32>
    %59 = vector.extract_strided_slice %3 {offsets = [7, 0], sizes = [1, 128], strides = [1, 1]} : vector<9x128xf32> to vector<1x128xf32>
    %60 = vector.shape_cast %59 : vector<1x128xf32> to vector<128xf32>
    %61 = vector.shape_cast %60 : vector<128xf32> to vector<1x1x128xf32>
    %62 = vector.extract_strided_slice %5 {offsets = [2, 0, 0], sizes = [8, 8, 128], strides = [1, 1, 1]} : vector<10x8x128xf32> to vector<8x8x128xf32>
    %63 = vector.broadcast %61 : vector<1x1x128xf32> to vector<8x8x128xf32>
    %64 = arith.mulf %62, %63 : vector<8x8x128xf32>
    %65 = arith.addf %58, %64 : vector<8x8x128xf32>
    %c7_i32 = arith.constant 7 : i32
    %66 = tpu.dynamic_rotate %5 by %c7_i32 dim 1 : vector<10x8x128xf32>, i32 -> vector<10x8x128xf32>
    %c1_i32_6 = arith.constant 1 : i32
    %67 = vector.broadcast %c1_i32_6 : i32 to vector<1x8x128xi32>
    %68 = arith.addi %6, %67 : vector<1x8x128xi32>
    %c0_i32_7 = arith.constant 0 : i32
    %69 = vector.broadcast %c0_i32_7 : i32 to vector<1x8x128xi32>
    %70 = arith.cmpi sge, %68, %69 : vector<1x8x128xi32>
    %c1_i32_8 = arith.constant 1 : i32
    %71 = vector.broadcast %c1_i32_8 : i32 to vector<1x8x128xi32>
    %72 = arith.addi %6, %71 : vector<1x8x128xi32>
    %c8_i32_9 = arith.constant 8 : i32
    %73 = vector.broadcast %c8_i32_9 : i32 to vector<1x8x128xi32>
    %74 = arith.cmpi slt, %72, %73 : vector<1x8x128xi32>
    %75 = arith.andi %70, %74 : vector<1x8x128xi1>
    %76 = arith.extui %75 : vector<1x8x128xi1> to vector<1x8x128xi32>
    %77 = arith.sitofp %76 : vector<1x8x128xi32> to vector<1x8x128xf32>
    %78 = vector.extract_strided_slice %3 {offsets = [2, 0], sizes = [1, 128], strides = [1, 1]} : vector<9x128xf32> to vector<1x128xf32>
    %79 = vector.shape_cast %78 : vector<1x128xf32> to vector<128xf32>
    %80 = vector.shape_cast %79 : vector<128xf32> to vector<1x1x128xf32>
    %81 = vector.broadcast %80 : vector<1x1x128xf32> to vector<1x8x128xf32>
    %82 = arith.mulf %81, %77 : vector<1x8x128xf32>
    %83 = vector.extract_strided_slice %66 {offsets = [0, 0, 0], sizes = [8, 8, 128], strides = [1, 1, 1]} : vector<10x8x128xf32> to vector<8x8x128xf32>
    %84 = vector.broadcast %82 : vector<1x8x128xf32> to vector<8x8x128xf32>
    %85 = arith.mulf %83, %84 : vector<8x8x128xf32>
    %86 = arith.addf %65, %85 : vector<8x8x128xf32>
    %87 = vector.extract_strided_slice %3 {offsets = [5, 0], sizes = [1, 128], strides = [1, 1]} : vector<9x128xf32> to vector<1x128xf32>
    %88 = vector.shape_cast %87 : vector<1x128xf32> to vector<128xf32>
    %89 = vector.shape_cast %88 : vector<128xf32> to vector<1x1x128xf32>
    %90 = vector.broadcast %89 : vector<1x1x128xf32> to vector<1x8x128xf32>
    %91 = arith.mulf %90, %77 : vector<1x8x128xf32>
    %92 = vector.extract_strided_slice %66 {offsets = [1, 0, 0], sizes = [8, 8, 128], strides = [1, 1, 1]} : vector<10x8x128xf32> to vector<8x8x128xf32>
    %93 = vector.broadcast %91 : vector<1x8x128xf32> to vector<8x8x128xf32>
    %94 = arith.mulf %92, %93 : vector<8x8x128xf32>
    %95 = arith.addf %86, %94 : vector<8x8x128xf32>
    %96 = vector.extract_strided_slice %3 {offsets = [8, 0], sizes = [1, 128], strides = [1, 1]} : vector<9x128xf32> to vector<1x128xf32>
    %97 = vector.shape_cast %96 : vector<1x128xf32> to vector<128xf32>
    %98 = vector.shape_cast %97 : vector<128xf32> to vector<1x1x128xf32>
    %99 = vector.broadcast %98 : vector<1x1x128xf32> to vector<1x8x128xf32>
    %100 = arith.mulf %99, %77 : vector<1x8x128xf32>
    %101 = vector.extract_strided_slice %66 {offsets = [2, 0, 0], sizes = [8, 8, 128], strides = [1, 1, 1]} : vector<10x8x128xf32> to vector<8x8x128xf32>
    %102 = vector.broadcast %100 : vector<1x8x128xf32> to vector<8x8x128xf32>
    %103 = arith.mulf %101, %102 : vector<8x8x128xf32>
    %104 = arith.addf %95, %103 : vector<8x8x128xf32>
    %c0_10 = arith.constant 0 : index
    %c0_11 = arith.constant 0 : index
    %105 = vector.load %arg3[%c0_10, %c0_11] : memref<1x128xf32, #tpu.memory_space<vmem>>, vector<1x128xf32>
    %106 = vector.shape_cast %105 : vector<1x128xf32> to vector<1x1x128xf32>
    %107 = vector.broadcast %106 : vector<1x1x128xf32> to vector<8x8x128xf32>
    %108 = arith.addf %104, %107 : vector<8x8x128xf32>
    %cst_12 = arith.constant 5.000000e-01 : f32
    %109 = vector.broadcast %cst_12 : f32 to vector<8x8x128xf32>
    %110 = arith.mulf %109, %108 : vector<8x8x128xf32>
    %cst_13 = arith.constant 4.471500e-02 : f32
    %111 = vector.broadcast %cst_13 : f32 to vector<8x8x128xf32>
    %112 = arith.mulf %111, %108 : vector<8x8x128xf32>
    %113 = arith.mulf %112, %108 : vector<8x8x128xf32>
    %114 = arith.mulf %113, %108 : vector<8x8x128xf32>
    %115 = arith.addf %108, %114 : vector<8x8x128xf32>
    %cst_14 = arith.constant 0.797884583 : f32
    %116 = vector.broadcast %cst_14 : f32 to vector<8x8x128xf32>
    %117 = arith.mulf %116, %115 : vector<8x8x128xf32>
    %118 = math.tanh %117 : vector<8x8x128xf32>
    %cst_15 = arith.constant 1.000000e+00 : f32
    %119 = vector.broadcast %cst_15 : f32 to vector<8x8x128xf32>
    %120 = arith.addf %119, %118 : vector<8x8x128xf32>
    %121 = arith.mulf %110, %120 : vector<8x8x128xf32>
    %c0_16 = arith.constant 0 : index
    %c0_17 = arith.constant 0 : index
    %122 = vector.load %arg4[%c0_16, %c0_17] : memref<1x128xf32, #tpu.memory_space<vmem>>, vector<1x128xf32>
    %123 = vector.shape_cast %122 : vector<1x128xf32> to vector<1x1x128xf32>
    %124 = vector.broadcast %123 : vector<1x1x128xf32> to vector<8x8x128xf32>
    %125 = arith.mulf %121, %124 : vector<8x8x128xf32>
    %c0_18 = arith.constant 0 : index
    %c0_19 = arith.constant 0 : index
    %126 = vector.load %arg5[%c0_18, %c0_19] : memref<1x128xf32, #tpu.memory_space<vmem>>, vector<1x128xf32>
    %127 = vector.shape_cast %126 : vector<1x128xf32> to vector<1x1x128xf32>
    %128 = vector.broadcast %127 : vector<1x1x128xf32> to vector<8x8x128xf32>
    %129 = arith.addf %125, %128 : vector<8x8x128xf32>
    %130 = arith.addf %129, %2 : vector<8x8x128xf32>
    %131 = vector.shape_cast %130 : vector<8x8x128xf32> to vector<64x128xf32>
    %132 = arith.truncf %131 : vector<64x128xf32> to vector<64x128xbf16>
    %c0_20 = arith.constant 0 : index
    %c0_21 = arith.constant 0 : index
    %133 = vector.load %arg6[%c0_20, %c0_21] : memref<128x128xbf16, #tpu.memory_space<vmem>>, vector<128x128xbf16>
    %cst_22 = arith.constant dense<0.000000e+00> : vector<64x128xf32>
    %134 = tpu.matmul %132, %133, %cst_22 {dimension_numbers = #tpu.dot_dimension_numbers<[1], [0], [0], [1], [0, 0, 1, 1], [], []>} : vector<64x128xbf16>, vector<128x128xbf16>, vector<64x128xf32> -> vector<64x128xf32>
    %c0_23 = arith.constant 0 : index
    %c0_24 = arith.constant 0 : index
    %135 = vector.load %arg7[%c0_23, %c0_24] : memref<1x128xf32, #tpu.memory_space<vmem>>, vector<1x128xf32>
    %136 = vector.shape_cast %135 : vector<1x128xf32> to vector<128xf32>
    %137 = vector.shape_cast %136 : vector<128xf32> to vector<1x128xf32>
    %138 = vector.broadcast %137 : vector<1x128xf32> to vector<64x128xf32>
    %139 = arith.addf %134, %138 : vector<64x128xf32>
    %cst_25 = arith.constant 5.000000e-01 : f32
    %140 = vector.broadcast %cst_25 : f32 to vector<64x128xf32>
    %141 = arith.mulf %140, %139 : vector<64x128xf32>
    %cst_26 = arith.constant 4.471500e-02 : f32
    %142 = vector.broadcast %cst_26 : f32 to vector<64x128xf32>
    %143 = arith.mulf %142, %139 : vector<64x128xf32>
    %144 = arith.mulf %143, %139 : vector<64x128xf32>
    %145 = arith.mulf %144, %139 : vector<64x128xf32>
    %146 = arith.addf %139, %145 : vector<64x128xf32>
    %cst_27 = arith.constant 0.797884583 : f32
    %147 = vector.broadcast %cst_27 : f32 to vector<64x128xf32>
    %148 = arith.mulf %147, %146 : vector<64x128xf32>
    %149 = math.tanh %148 : vector<64x128xf32>
    %cst_28 = arith.constant 1.000000e+00 : f32
    %150 = vector.broadcast %cst_28 : f32 to vector<64x128xf32>
    %151 = arith.addf %150, %149 : vector<64x128xf32>
    %152 = arith.mulf %141, %151 : vector<64x128xf32>
    %c0_29 = arith.constant 0 : index
    %c0_30 = arith.constant 0 : index
    %153 = vector.load %arg8[%c0_29, %c0_30] : memref<1x128xf32, #tpu.memory_space<vmem>>, vector<1x128xf32>
    %154 = vector.shape_cast %153 : vector<1x128xf32> to vector<128xf32>
    %155 = vector.shape_cast %154 : vector<128xf32> to vector<1x128xf32>
    %156 = vector.broadcast %155 : vector<1x128xf32> to vector<64x128xf32>
    %157 = arith.mulf %152, %156 : vector<64x128xf32>
    %c0_31 = arith.constant 0 : index
    %c0_32 = arith.constant 0 : index
    %158 = vector.load %arg9[%c0_31, %c0_32] : memref<1x128xf32, #tpu.memory_space<vmem>>, vector<1x128xf32>
    %159 = vector.shape_cast %158 : vector<1x128xf32> to vector<128xf32>
    %160 = vector.shape_cast %159 : vector<128xf32> to vector<1x128xf32>
    %161 = vector.broadcast %160 : vector<1x128xf32> to vector<64x128xf32>
    %162 = arith.addf %157, %161 : vector<64x128xf32>
    %163 = arith.addf %162, %131 : vector<64x128xf32>
    %164 = vector.shape_cast %163 : vector<64x128xf32> to vector<8x8x128xf32>
    %165 = arith.truncf %164 : vector<8x8x128xf32> to vector<8x8x128xbf16>
    %c0_33 = arith.constant 0 : index
    %c0_34 = arith.constant 0 : index
    %c0_35 = arith.constant 0 : index
    %c0_36 = arith.constant 0 : index
    %166 = vector.load %arg10[%c0_33, %c0_34, %c0_35, %c0_36] : memref<1x8x8x128xbf16, #tpu.memory_space<vmem>>, vector<1x8x8x128xbf16>
    %167 = vector.shape_cast %166 : vector<1x8x8x128xbf16> to vector<8x8x128xbf16>
    %168 = vector.shape_cast %165 : vector<8x8x128xbf16> to vector<1x8x8x128xbf16>
    tpu.vector_store %arg10[%c0_33, %c0_34, %c0_35, %c0_36], %168 {strides = array<i32>} : memref<1x8x8x128xbf16, #tpu.memory_space<vmem>>, vector<1x8x8x128xbf16>,
    %cst_37 = arith.constant dense<0.000000e+00> : vector<128xf32>
    %169 = vector.multi_reduction <add>, %163, %cst_37 [0] : vector<64x128xf32> to vector<128xf32>
    %170 = vector.shape_cast %169 : vector<128xf32> to vector<1x128xf32>
    %cst_38 = arith.constant 6.400000e+01 : f32
    %171 = vector.broadcast %cst_38 : f32 to vector<1x128xf32>
    %172 = arith.divf %170, %171 : vector<1x128xf32>
    %c0_39 = arith.constant 0 : index
    %c0_40 = arith.constant 0 : index
    %c0_41 = arith.constant 0 : index
    %173 = vector.load %arg11[%c0_39, %c0_40, %c0_41] : memref<1x1x128xf32, #tpu.memory_space<vmem>>, vector<1x1x128xf32>
    %174 = vector.shape_cast %173 : vector<1x1x128xf32> to vector<1x128xf32>
    %175 = vector.shape_cast %172 : vector<1x128xf32> to vector<1x1x128xf32>
    tpu.vector_store %arg11[%c0_39, %c0_40, %c0_41], %175 {strides = array<i32>} : memref<1x1x128xf32, #tpu.memory_space<vmem>>, vector<1x1x128xf32>,
    return
  }
  func.func @transform_0(%arg0: i32) -> (i32, i32, i32, i32) {
    %c0_i32 = arith.constant 0 : i32
    %c0_i32_0 = arith.constant 0 : i32
    %c0_i32_1 = arith.constant 0 : i32
    %c0_i32_2 = arith.constant 0 : i32
    return %arg0, %c0_i32, %c0_i32_0, %c0_i32_1 : i32, i32, i32, i32
  }
  func.func @transform_1(%arg0: i32) -> (i32, i32) {
    %c0_i32 = arith.constant 0 : i32
    %c0_i32_0 = arith.constant 0 : i32
    %c0_i32_1 = arith.constant 0 : i32
    return %c0_i32, %c0_i32_0 : i32, i32
  }
  func.func @transform_2(%arg0: i32) -> (i32, i32) {
    %c0_i32 = arith.constant 0 : i32
    %c0_i32_0 = arith.constant 0 : i32
    %c0_i32_1 = arith.constant 0 : i32
    return %c0_i32, %c0_i32_0 : i32, i32
  }
  func.func @transform_3(%arg0: i32) -> (i32, i32) {
    %c0_i32 = arith.constant 0 : i32
    %c0_i32_0 = arith.constant 0 : i32
    %c0_i32_1 = arith.constant 0 : i32
    return %c0_i32, %c0_i32_0 : i32, i32
  }
  func.func @transform_4(%arg0: i32) -> (i32, i32) {
    %c0_i32 = arith.constant 0 : i32
    %c0_i32_0 = arith.constant 0 : i32
    %c0_i32_1 = arith.constant 0 : i32
    return %c0_i32, %c0_i32_0 : i32, i32
  }
  func.func @transform_5(%arg0: i32) -> (i32, i32) {
    %c0_i32 = arith.constant 0 : i32
    %c0_i32_0 = arith.constant 0 : i32
    %c0_i32_1 = arith.constant 0 : i32
    return %c0_i32, %c0_i32_0 : i32, i32
  }
  func.func @transform_6(%arg0: i32) -> (i32, i32) {
    %c0_i32 = arith.constant 0 : i32
    %c0_i32_0 = arith.constant 0 : i32
    %c0_i32_1 = arith.constant 0 : i32
    return %c0_i32, %c0_i32_0 : i32, i32
  }
  func.func @transform_7(%arg0: i32) -> (i32, i32) {
    %c0_i32 = arith.constant 0 : i32
    %c0_i32_0 = arith.constant 0 : i32
    %c0_i32_1 = arith.constant 0 : i32
    return %c0_i32, %c0_i32_0 : i32, i32
  }
  func.func @transform_8(%arg0: i32) -> (i32, i32) {
    %c0_i32 = arith.constant 0 : i32
    %c0_i32_0 = arith.constant 0 : i32
    %c0_i32_1 = arith.constant 0 : i32
    return %c0_i32, %c0_i32_0 : i32, i32
  }
  func.func @transform_9(%arg0: i32) -> (i32, i32, i32, i32) {
    %c0_i32 = arith.constant 0 : i32
    %c0_i32_0 = arith.constant 0 : i32
    %c0_i32_1 = arith.constant 0 : i32
    %c0_i32_2 = arith.constant 0 : i32
    return %arg0, %c0_i32, %c0_i32_0, %c0_i32_1 : i32, i32, i32, i32
  }
  func.func @transform_10(%arg0: i32) -> (i32, i32, i32) {
    %c0_i32 = arith.constant 0 : i32
    %c0_i32_0 = arith.constant 0 : i32
    %c0_i32_1 = arith.constant 0 : i32
    return %arg0, %c0_i32, %c0_i32_0 : i32, i32, i32
  }
}

module attributes {stable_mosaic.version = 11 : i64} {
  func.func @_head_kernel(%arg0: memref<2x128xf32, #tpu.memory_space<vmem>>, %arg1: memref<128x10xbf16, #tpu.memory_space<vmem>>, %arg2: memref<1x10xf32, #tpu.memory_space<vmem>>, %arg3: memref<2x10xf32, #tpu.memory_space<vmem>>) attributes {dimension_semantics = [], scalar_prefetch = 0 : i64, scratch_operands = 0 : i64, tpu.core_type = #tpu.core_type<tc>} {
    %c0 = arith.constant 0 : index
    %c0_0 = arith.constant 0 : index
    %0 = vector.load %arg0[%c0, %c0_0] : memref<2x128xf32, #tpu.memory_space<vmem>>, vector<2x128xf32>
    %1 = arith.truncf %0 : vector<2x128xf32> to vector<2x128xbf16>
    %c0_1 = arith.constant 0 : index
    %c0_2 = arith.constant 0 : index
    %2 = vector.load %arg1[%c0_1, %c0_2] : memref<128x10xbf16, #tpu.memory_space<vmem>>, vector<128x10xbf16>
    %cst = arith.constant dense<0.000000e+00> : vector<2x10xf32>
    %3 = tpu.matmul %1, %2, %cst {dimension_numbers = #tpu.dot_dimension_numbers<[1], [0], [0], [1], [0, 0, 1, 1], [], []>} : vector<2x128xbf16>, vector<128x10xbf16>, vector<2x10xf32> -> vector<2x10xf32>
    %c0_3 = arith.constant 0 : index
    %c0_4 = arith.constant 0 : index
    %4 = vector.load %arg2[%c0_3, %c0_4] : memref<1x10xf32, #tpu.memory_space<vmem>>, vector<1x10xf32>
    %5 = vector.shape_cast %4 : vector<1x10xf32> to vector<10xf32>
    %6 = vector.shape_cast %5 : vector<10xf32> to vector<1x10xf32>
    %7 = vector.broadcast %6 : vector<1x10xf32> to vector<2x10xf32>
    %8 = arith.addf %3, %7 : vector<2x10xf32>
    %c0_5 = arith.constant 0 : index
    %c0_6 = arith.constant 0 : index
    %9 = vector.load %arg3[%c0_5, %c0_6] : memref<2x10xf32, #tpu.memory_space<vmem>>, vector<2x10xf32>
    tpu.vector_store %arg3[%c0_5, %c0_6], %8 {strides = array<i32>} : memref<2x10xf32, #tpu.memory_space<vmem>>, vector<2x10xf32>,
    return
  }
}

</mosaic_0001>

<bundles_post_ra>
// kernel: convmixer_forward.4
= control target key start
LH: loop header
LB: loop body
LE: loop exit
PB: predicated region body
PF: predicated region fallthrough
CT: control target
= control target key end

     0   :  { %vm105_vm0 = vcmask 392192   ;;  %s809_s1 = inlined_call_operand.vmem [shape: bf16[48,128], index: 1, kind: input, shape index: {}]   ;;  %s810_s2 = inlined_call_operand.vmem [shape: f32[1,128], index: 2, kind: input, shape index: {}]   ;;  %s811_s3 = inlined_call_operand.vmem [shape: f32[1,128], index: 3, kind: input, shape index: {}]   ;;  %s812_s4 = inlined_call_operand.vmem [shape: f32[1,128], index: 4, kind: input, shape index: {}]   ;;  %s813_s0 = inlined_call_operand.vmem [shape: bf16[128,48], index: 0, kind: input, shape index: {}]   ;;  %s814_s5 = inlined_call_operand.vmem [shape: bf16[128,128], index: 5, kind: output, shape index: {}]  }
   0x1   :  { %v461_v0 = vld [vmem:[%s809_s1 + $0x10] sm:$0xff]  ;;  %v460_v1 = vld [vmem:[%s809_s1 + $0x8] sm:$0xff]  ;;  %v459_v2 = vld [vmem:[%s809_s1] sm:$0xff] }
   0x2   :  { %135 = vmatpush.bf16.msra.mxu0 %v461_v0  ;;  %509 = vmatpush.bf16.msra.mxu1 %v461_v0  ;;  %v451_v3 = vld [vmem:[%s813_s0] sm:$0xff]  ;;  %v453_v4 = vld [vmem:[%s813_s0 + $0x10] sm:$0xff]  ;;  %v452_v7 = vld [vmem:[%s813_s0 + $0x8] sm:$0xff] }
   0x3   :  { %510 = vmatpush.bf16.msra.mxu2 %v461_v0  ;;  %511 = vmatpush.bf16.msra.mxu3 %v461_v0  ;;  %v455_v5 = vld [vmem:[%s813_s0 + $0x20] sm:$0xff]  ;;  %v457_v6 = vld [vmem:[%s813_s0 + $0x30] sm:$0xff]  ;;  %v454_v8 = vld [vmem:[%s813_s0 + $0x18] sm:$0xff] }
   0x4   :  { %v456_v9 = vld [vmem:[%s813_s0 + $0x28] sm:$0xff]  ;;  %v458_v10 = vld [vmem:[%s813_s0 + $0x38] sm:$0xff]  ;;  %v627_v11 = vld [vmem:[%s810_s2] ss:$0 sm:$0xff] }
   0x6   :  { %136 = vmatpush.bf16.msra.mxu0 %v460_v1  ;;  %512 = vmatpush.bf16.msra.mxu1 %v460_v1 }
   0x7   :  { %513 = vmatpush.bf16.msra.mxu2 %v460_v1  ;;  %514 = vmatpush.bf16.msra.mxu3 %v460_v1 }
   0xa   :  { %137 = vmatpush.bf16.msra.mxu0 %v459_v2  ;;  %515 = vmatpush.bf16.msra.mxu1 %v459_v2 }
   0xb   :  { %516 = vmatpush.bf16.msra.mxu2 %v459_v2  ;;  %517 = vmatpush.bf16.msra.mxu3 %v459_v2 }
   0xd   :  { %443 = vmatmul.msk.bf16.vlgmr.msra.gmra.mxu0 %vm105_vm0, %v451_v3  ;;  %445 = vmatmul.msk.bf16.vlgmr.msra.gmra.mxu1 %vm105_vm0, %v453_v4 }
   0xe   :  { %447 = vmatmul.msk.bf16.vlgmr.msra.gmra.mxu2 %vm105_vm0, %v455_v5  ;;  %449 = vmatmul.msk.bf16.vlgmr.msra.gmra.mxu3 %vm105_vm0, %v457_v6 }
  0x1d   :  { %444 = vmatmul.msk.bf16.gmra.mxu0 %vm105_vm0, %v452_v7  ;;  %446 = vmatmul.msk.bf16.gmra.mxu1 %vm105_vm0, %v454_v8 }
  0x1e   :  { %448 = vmatmul.msk.bf16.gmra.mxu2 %vm105_vm0, %v456_v9  ;;  %450 = vmatmul.msk.bf16.gmra.mxu3 %vm105_vm0, %v458_v10 }
  0x8a   :  { %v139_v12 = vpop.f32.mrf.mxu0  ;;  %v149_v13 = vpop.f32.mrf.mxu1 }
  0x8b   :  { %v140_v14 = vadd.f32 %v627_v11, %v139_v12  ;;  %v150_v15 = vadd.f32 %v627_v11, %v149_v13  ;;  %v680_v13 = vld [vmem:[%s811_s3] ss:$0 sm:$0xff] }
  0x8d   :  { %v195_v16 = vmul.f32 0.044715, %v140_v14  ;;  %v199_v17 = vmul.f32 0.044715, %v150_v15  ;;  %v179_v59 = vmul.f32 0.5, %v140_v14  ;;  %v183_v6 = vmul.f32 0.5, %v150_v15 }
  0x8f   :  { %v211_v18 = vmul.f32 %v195_v16, %v140_v14  ;;  %v215_v19 = vmul.f32 %v199_v17, %v150_v15 }
  0x91   :  { %v227_v20 = vmul.f32 %v211_v18, %v140_v14  ;;  %v231_v21 = vmul.f32 %v215_v19, %v150_v15  ;;  %v159_v22 = vpop.f32.mrf.mxu2  ;;  %v169_v23 = vpop.f32.mrf.mxu3 }
  0x92   :  { %v632_v24 = vadd.f32 %v627_v11, %v159_v22  ;;  %v635_v25 = vadd.f32 %v627_v11, %v169_v23  ;;  %v141_v26 = vpop.f32.mrf.mxu0  ;;  %v151_v27 = vpop.f32.mrf.mxu1 }
  0x93   :  { %v243_v28 = vadd.f32 %v227_v20, %v140_v14  ;;  %v247_v29 = vadd.f32 %v231_v21, %v150_v15  ;;  %v638_v30 = vadd.f32 %v627_v11, %v141_v26  ;;  %v641_v31 = vadd.f32 %v627_v11, %v151_v27 }
  0x94   :  { %v203_v32 = vmul.f32 0.044715, %v632_v24  ;;  %v207_v33 = vmul.f32 0.044715, %v635_v25  ;;  %v187_v21 = vmul.f32 0.5, %v632_v24 }
  0x95   :  { %v259_v34 = vmul.f32 0.7978846, %v243_v28  ;;  %v263_v35 = vmul.f32 0.7978846, %v247_v29  ;;  %v196_v38 = vmul.f32 0.044715, %v638_v30 }
  0x96   :  { %v219_v36 = vmul.f32 %v203_v32, %v632_v24  ;;  %v223_v37 = vmul.f32 %v207_v33, %v635_v25  ;;  %v200_v39 = vmul.f32 0.044715, %v641_v31  ;;  %v180_v28 = vmul.f32 0.5, %v638_v30 }
  0x97   :  { %521 = vtanh.f32 %v259_v34  ;;  %v212_v42 = vmul.f32 %v196_v38, %v638_v30 }
  0x98   :  { %523 = vtanh.f32 %v263_v35  ;;  %v235_v40 = vmul.f32 %v219_v36, %v632_v24  ;;  %v239_v41 = vmul.f32 %v223_v37, %v635_v25  ;;  %v216_v43 = vmul.f32 %v200_v39, %v641_v31  ;;  %v700_v39 = vld [vmem:[%s812_s4] ss:$0 sm:$0xff] }
  0x99   :  { %v161_v44 = vpop.f32.mrf.mxu2  ;;  %v171_v45 = vpop.f32.mrf.mxu3  ;;  %v228_v48 = vmul.f32 %v212_v42, %v638_v30  ;;  %v184_v37 = vmul.f32 0.5, %v641_v31 }
  0x9a   :  { %v251_v46 = vadd.f32 %v235_v40, %v632_v24  ;;  %v255_v47 = vadd.f32 %v239_v41, %v635_v25  ;;  %v657_v49 = vadd.f32 %v627_v11, %v161_v44  ;;  %v144_v50 = vpop.f32.mrf.mxu0  ;;  %v232_v51 = vmul.f32 %v216_v43, %v641_v31  ;;  %v154_v53 = vpop.f32.mrf.mxu1 }
  0x9b   :  { %v661_v52 = vadd.f32 %v627_v11, %v171_v45  ;;  %v244_v56 = vadd.f32 %v228_v48, %v638_v30  ;;  %v665_v57 = vadd.f32 %v627_v11, %v144_v50  ;;  %v671_v2 = vadd.f32 %v627_v11, %v154_v53 }
  0x9c   :  { %v267_v54 = vmul.f32 0.7978846, %v251_v46  ;;  %v271_v55 = vmul.f32 0.7978846, %v255_v47  ;;  %v248_v60 = vadd.f32 %v232_v51, %v641_v31  ;;  %v204_v61 = vmul.f32 0.044715, %v657_v49 }
  0x9d   :  { %v522_v58 = vpop.eup %521  ;;  %v208_v62 = vmul.f32 0.044715, %v661_v52  ;;  %v260_v1 = vmul.f32 0.7978846, %v244_v56  ;;  %v197_v8 = vmul.f32 0.044715, %v665_v57 }
  0x9e   :  { %v524_v63 = vpop.eup %523  ;;  %v291_v0 = vadd.f32 1.0, %v522_v58  ;;  %525 = vtanh.f32 %v267_v54  ;;  %v264_v4 = vmul.f32 0.7978846, %v248_v60  ;;  %v220_v5 = vmul.f32 %v204_v61, %v657_v49 }
  0x9f   :  { %v295_v3 = vadd.f32 1.0, %v524_v63  ;;  %527 = vtanh.f32 %v271_v55  ;;  %v224_v7 = vmul.f32 %v208_v62, %v661_v52  ;;  %v213_v15 = vmul.f32 %v197_v8, %v665_v57 }
  0xa0   :  { %529 = vtanh.f32 %v260_v1  ;;  %v307_v9 = vmul.f32 %v291_v0, %v179_v59  ;;  %v236_v10 = vmul.f32 %v220_v5, %v657_v49  ;;  %v201_v17 = vmul.f32 0.044715, %v671_v2 }
  0xa1   :  { %531 = vtanh.f32 %v264_v4  ;;  %v164_v12 = vpop.f32.mrf.mxu2  ;;  %v311_v14 = vmul.f32 %v295_v3, %v183_v6  ;;  %v240_v16 = vmul.f32 %v224_v7, %v661_v52  ;;  %v229_v32 = vmul.f32 %v213_v15, %v665_v57  ;;  %v174_v33 = vpop.f32.mrf.mxu3 }
  0xa2   :  { %v252_v18 = vadd.f32 %v236_v10, %v657_v49  ;;  %v687_v19 = vadd.f32 %v627_v11, %v164_v12  ;;  %v217_v23 = vmul.f32 %v201_v17, %v671_v2  ;;  %v327_v35 = vmul.f32 %v680_v13, %v307_v9  ;;  %v146_v48 = vpop.f32.mrf.mxu0  ;;  %v156_v60 = vpop.f32.mrf.mxu1 }
  0xa3   :  { %v256_v22 = vadd.f32 %v240_v16, %v661_v52  ;;  %v331_v36 = vmul.f32 %v680_v13, %v311_v14  ;;  %v705_v44 = vadd.f32 %v627_v11, %v174_v33  ;;  %v245_v46 = vadd.f32 %v229_v32, %v665_v57 }
  0xa4   :  { %v526_v20 = vpop.eup %525  ;;  %v268_v29 = vmul.f32 0.7978846, %v252_v18  ;;  %v233_v30 = vmul.f32 %v217_v23, %v671_v2  ;;  %v205_v41 = vmul.f32 0.044715, %v687_v19  ;;  %v191_v50 = vmul.f32 0.5, %v635_v25 }
  0xa5   :  { %v528_v26 = vpop.eup %527  ;;  %v299_v27 = vadd.f32 1.0, %v526_v20  ;;  %v272_v24 = vmul.f32 0.7978846, %v256_v22  ;;  %v188_v53 = vmul.f32 0.5, %v657_v49  ;;  %v192_v54 = vmul.f32 0.5, %v661_v52 }
  0xa6   :  { %v530_v34 = vpop.eup %529  ;;  %533 = vtanh.f32 %v268_v29  ;;  %v303_v42 = vadd.f32 1.0, %v528_v26  ;;  %v221_v47 = vmul.f32 %v205_v41, %v687_v19  ;;  %v347_v55 = vadd.f32 %v700_v39, %v327_v35 }
  0xa7   :  { %v532_v38 = vpop.eup %531  ;;  %v292_v40 = vadd.f32 1.0, %v530_v34  ;;  %535 = vtanh.f32 %v272_v24  ;;  %v315_v31 = vmul.f32 %v299_v27, %v187_v21  ;;  %v351_v56 = vadd.f32 %v700_v39, %v331_v36 }
  0xa8   :  { %v296_v43 = vadd.f32 1.0, %v532_v38  ;;  %v249_v59 = vadd.f32 %v233_v30, %v671_v2  ;;  %v237_v62 = vmul.f32 %v221_v47, %v687_v19  ;;  %v209_v25 = vmul.f32 0.044715, %v705_v44 }
  0xa9   :  { %v308_v45 = vmul.f32 %v292_v40, %v180_v28  ;;  %v720_v63 = vadd.f32 %v627_v11, %v146_v48  ;;  %v335_v52 = vmul.f32 %v680_v13, %v315_v31  ;;  %v319_v0 = vmul.f32 %v303_v42, %v191_v50  ;;  %v166_v20 = vpop.f32.mrf.mxu2  ;;  %v176_v29 = vpop.f32.mrf.mxu3 }
  0xaa   :  { %v312_v51 = vmul.f32 %v296_v43, %v184_v37  ;;  %v261_v3 = vmul.f32 0.7978846, %v245_v46  ;;  %v225_v7 = vmul.f32 %v209_v25, %v705_v44  ;;  %v727_v8 = vadd.f32 %v627_v11, %v156_v60 }
  0xab   :  { %v328_v58 = vmul.f32 %v680_v13, %v308_v45  ;;  %v265_v12 = vmul.f32 0.7978846, %v249_v59  ;;  %v198_v14 = vmul.f32 0.044715, %v720_v63  ;;  %v253_v17 = vadd.f32 %v237_v62, %v687_v19 }
  0xac   :  { %v332_v61 = vmul.f32 %v680_v13, %v312_v51  ;;  %v534_v49 = vpop.eup %533  ;;  %v241_v18 = vmul.f32 %v225_v7, %v705_v44  ;;  %v339_v21 = vmul.f32 %v680_v13, %v319_v0  ;;  %537 = vtanh.f32 %v261_v3 }
  0xad   :  { %v348_v1 = vadd.f32 %v700_v39, %v328_v58  ;;  %v536_v4 = vpop.eup %535  ;;  %v300_v6 = vadd.f32 1.0, %v534_v49  ;;  %v214_v23 = vmul.f32 %v198_v14, %v720_v63  ;;  %v355_v26 = vadd.f32 %v700_v39, %v335_v52 }
  0xae   :  { %v352_v5 = vadd.f32 %v700_v39, %v332_v61  ;;  %v304_v10 = vadd.f32 1.0, %v536_v4  ;;  %v202_v28 = vmul.f32 0.044715, %v727_v8  ;;  %v257_v33 = vadd.f32 %v241_v18, %v705_v44 }
  0xaf   :  { %v465_v9 = vpack.c.bf16 %v348_v1, %v347_v55  ;;  %v316_v15 = vmul.f32 %v300_v6, %v188_v53  ;;  %v230_v34 = vmul.f32 %v214_v23, %v720_v63  ;;  %v747_v35 = vadd.f32 %v627_v11, %v166_v20 }
  0xb0   :  { %v475_v16 = vpack.c.bf16 %v352_v5, %v351_v56  ;;  %v320_v22 = vmul.f32 %v304_v10, %v192_v54  ;;  %539 = vtanh.f32 %v265_v12  ;;  %v269_v37 = vmul.f32 0.7978846, %v253_v17 }
  0xb1   :  { %466 = vst [vmem:[%s814_s5] sm:$0xff] %v465_v9   ;;  %v336_v27 = vmul.f32 %v680_v13, %v316_v15  ;;  %v218_v24 = vmul.f32 %v202_v28, %v727_v8  ;;  %v359_v38 = vadd.f32 %v700_v39, %v339_v21  ;;  %v246_v30 = vadd.f32 %v230_v34, %v720_v63 }
  0xb2   :  { %503 = vst [vmem:[%s814_s5 + $0x10] sm:$0xff] %v475_v16   ;;  %v340_v32 = vmul.f32 %v680_v13, %v320_v22  ;;  %v755_v41 = vadd.f32 %v627_v11, %v176_v29  ;;  %v538_v31 = vpop.eup %537  ;;  %v273_v46 = vmul.f32 0.7978846, %v257_v33  ;;  %v206_v48 = vmul.f32 0.044715, %v747_v35 }
  0xb3   :  { %v356_v36 = vadd.f32 %v700_v39, %v336_v27  ;;  %v234_v43 = vmul.f32 %v218_v24, %v727_v8  ;;  %v262_v47 = vmul.f32 0.7978846, %v246_v30  ;;  %541 = vtanh.f32 %v269_v37 }
  0xb4   :  { %v360_v40 = vadd.f32 %v700_v39, %v340_v32  ;;  %v222_v11 = vmul.f32 %v206_v48, %v747_v35  ;;  %v210_v51 = vmul.f32 0.044715, %v755_v41  ;;  %v293_v54 = vadd.f32 1.0, %v538_v31 }
  0xb5   :  { %v485_v42 = vpack.c.bf16 %v356_v36, %v355_v26  ;;  %v250_v50 = vadd.f32 %v234_v43, %v727_v8  ;;  %543 = vtanh.f32 %v262_v47  ;;  %v181_v59 = vmul.f32 0.5, %v665_v57 }
  0xb6   :  { %v495_v45 = vpack.c.bf16 %v360_v40, %v359_v38  ;;  %v540_v53 = vpop.eup %539  ;;  %545 = vtanh.f32 %v273_v46  ;;  %v238_v56 = vmul.f32 %v222_v11, %v747_v35  ;;  %v226_v58 = vmul.f32 %v210_v51, %v755_v41 }
  0xb7   :  { %505 = vst [vmem:[%s814_s5 + $0x20] sm:$0xff] %v485_v42   ;;  %v266_v55 = vmul.f32 0.7978846, %v250_v50  ;;  %v297_v60 = vadd.f32 1.0, %v540_v53  ;;  %v309_v49 = vmul.f32 %v293_v54, %v181_v59  ;;  %v185_v0 = vmul.f32 0.5, %v671_v2 }
  0xb8   :  { %507 = vst [vmem:[%s814_s5 + $0x30] sm:$0xff] %v495_v45   ;;  %v254_v61 = vadd.f32 %v238_v56, %v747_v35  ;;  %v242_v62 = vmul.f32 %v226_v58, %v755_v41  ;;  %v182_v4 = vmul.f32 0.5, %v720_v63  ;;  %v186_v16 = vmul.f32 0.5, %v727_v8 }
  0xb9   :  { %547 = vtanh.f32 %v266_v55  ;;  %v542_v25 = vpop.eup %541  ;;  %v313_v7 = vmul.f32 %v297_v60, %v185_v0  ;;  %v329_v10 = vmul.f32 %v680_v13, %v309_v49  ;;  %v189_v2 = vmul.f32 0.5, %v687_v19 }
  0xba   :  { %v270_v1 = vmul.f32 0.7978846, %v254_v61  ;;  %v258_v3 = vadd.f32 %v242_v62, %v755_v41  ;;  %v301_v12 = vadd.f32 1.0, %v542_v25  ;;  %v193_v23 = vmul.f32 0.5, %v705_v44 }
  0xbb   :  { %v544_v52 = vpop.eup %543  ;;  %v333_v63 = vmul.f32 %v680_v13, %v313_v7  ;;  %v349_v21 = vadd.f32 %v700_v39, %v329_v10  ;;  %v190_v19 = vmul.f32 0.5, %v747_v35  ;;  %v194_v24 = vmul.f32 0.5, %v755_v41 }
  0xbc   :  { %v294_v5 = vadd.f32 1.0, %v544_v52  ;;  %v546_v6 = vpop.eup %545  ;;  %549 = vtanh.f32 %v270_v1  ;;  %v274_v57 = vmul.f32 0.7978846, %v258_v3  ;;  %v317_v22 = vmul.f32 %v301_v12, %v189_v2 }
  0xbd   :  { %v305_v17 = vadd.f32 1.0, %v546_v6  ;;  %v353_v34 = vadd.f32 %v700_v39, %v333_v63 }
  0xbe   :  { %v310_v14 = vmul.f32 %v294_v5, %v182_v4  ;;  %551 = vtanh.f32 %v274_v57  ;;  %v337_v37 = vmul.f32 %v680_v13, %v317_v22 }
  0xbf   :  { %v548_v9 = vpop.eup %547  ;;  %v321_v28 = vmul.f32 %v305_v17, %v193_v23 }
  0xc0   :  { %v298_v15 = vadd.f32 1.0, %v548_v9  ;;  %v330_v18 = vmul.f32 %v680_v13, %v310_v14  ;;  %v357_v43 = vadd.f32 %v700_v39, %v337_v37 }
  0xc1   :  { %v341_v30 = vmul.f32 %v680_v13, %v321_v28 }
  0xc2   :  { %v314_v20 = vmul.f32 %v298_v15, %v186_v16  ;;  %v350_v26 = vadd.f32 %v700_v39, %v330_v18  ;;  %v550_v27 = vpop.eup %549 }
  0xc3   :  { %v302_v32 = vadd.f32 1.0, %v550_v27  ;;  %v361_v46 = vadd.f32 %v700_v39, %v341_v30 }
  0xc4   :  { %v334_v8 = vmul.f32 %v680_v13, %v314_v20  ;;  %v470_v29 = vpack.c.bf16 %v350_v26, %v349_v21  ;;  %v552_v33 = vpop.eup %551 }
  0xc5   :  { %v318_v44 = vmul.f32 %v302_v32, %v190_v19  ;;  %v306_v38 = vadd.f32 1.0, %v552_v33 }
  0xc6   :  { %v354_v36 = vadd.f32 %v700_v39, %v334_v8  ;;  %502 = vst [vmem:[%s814_s5 + $0x8] sm:$0xff] %v470_v29  }
  0xc7   :  { %v338_v35 = vmul.f32 %v680_v13, %v318_v44  ;;  %v322_v42 = vmul.f32 %v306_v38, %v194_v24 }
  0xc8   :  { %v480_v40 = vpack.c.bf16 %v354_v36, %v353_v34 }
  0xc9   :  { %v358_v31 = vadd.f32 %v700_v39, %v338_v35  ;;  %v342_v45 = vmul.f32 %v680_v13, %v322_v42 }
  0xca   :  { %504 = vst [vmem:[%s814_s5 + $0x18] sm:$0xff] %v480_v40  }
  0xcb   :  { %v490_v41 = vpack.c.bf16 %v358_v31, %v357_v43  ;;  %v362_v47 = vadd.f32 %v700_v39, %v342_v45 }
  0xcd   :  { %506 = vst [vmem:[%s814_s5 + $0x28] sm:$0xff] %v490_v41   ;;  %v500_v48 = vpack.c.bf16 %v362_v47, %v361_v46 }
  0xcf   :  { %508 = vst [vmem:[%s814_s5 + $0x38] sm:$0xff] %v500_v48  }

// kernel: convmixer_forward.5
= control target key start
LH: loop header
LB: loop body
LE: loop exit
PB: predicated region body
PF: predicated region fallthrough
CT: control target
= control target key end

     0   :  { %s1152_s30 = smov 0   ;;  %s1563_s0 = inlined_call_operand.vmem [shape: bf16[2,8,8,128], index: 0, kind: input, shape index: {}, may-alias: {0,9}]   ;;  %s1564_s1 = inlined_call_operand.vmem [shape: f32[9,128], index: 1, kind: input, shape index: {}]   ;;  %s1565_s2 = inlined_call_operand.vmem [shape: f32[1,128], index: 2, kind: input, shape index: {}]   ;;  %s1566_s3 = inlined_call_operand.vmem [shape: f32[1,128], index: 3, kind: input, shape index: {}]   ;;  %s1567_s4 = inlined_call_operand.vmem [shape: f32[1,128], index: 4, kind: input, shape index: {}]   ;;  %s1568_s5 = inlined_call_operand.vmem [shape: bf16[128,128], index: 5, kind: input, shape index: {}]   ;;  %s1569_s6 = inlined_call_operand.vmem [shape: f32[1,128], index: 6, kind: input, shape index: {}]   ;;  %s1570_s7 = inlined_call_operand.vmem [shape: f32[1,128], index: 7, kind: input, shape index: {}]   ;;  %s1571_s8 = inlined_call_operand.vmem [shape: f32[1,128], index: 8, kind: input, shape index: {}]   ;;  %s1572_s9 = inlined_call_operand.vmem [shape: bf16[2,8,8,128], index: 9, kind: output, shape index: {}, may-alias: {0,9}]  }
   0x1 LB: > { %s924_s10 = sadd.s32 4294967295, %s1099_s30   ;;  %p928_p0 = scmp.ge.s32.totalorder %s1099_s30, 1  ;;  %s1099_s30 = sphi %s1152_s30, %s19_s30  }
   0x2   : > { %p287_p1 = scmp.lt.s32.totalorder %s1099_s30, 3 }
   0x4   : > { %p288_p2 = pnand %p928_p0, %p287_p1 }
   0x5   : > { %p323_p3 = scmp.lt.s32.totalorder (!%p288_p2), %s924_s10, 1 }
   0x6   : > { %291 = sbr.rel (%p288_p2) target bundleno = 281 (0x119), region = 56 }
   0xb   : > { %v978_v0 = vld [vmem:[%s1568_s5 + $0x38] sm:$0xff]  ;;  %v351_v1 = vlaneseq  ;;  %v977_v2 = vld [vmem:[%s1568_s5 + $0x30] sm:$0xff]  ;;  %s1574_s10 = smov (!%p323_p3, %s924_s10), 1  ;;  %v1171_v3 = vld [vmem:[%s1564_s1] sm:$0xff]  ;;  %v1101_v26 = vmov 0.0  }
   0xc   : > { %720 = vmatpush.bf16.msra.mxu0 %v978_v0  ;;  %1021 = vmatpush.bf16.msra.mxu1 %v978_v0  ;;  %v1174_v5 = vperm.slane %v1171_v3, 1  ;;  %s969_s17 = sshll.u32 %s1574_s10, 5  ;;  %v367_v7 = vperm.slane %v1171_v3, 0  ;;  %v377_v8 = vperm.slane %v1171_v3, 3  ;;  %v976_v10 = vld [vmem:[%s1568_s5 + $0x28] sm:$0xff]  ;;  %v395_v11 = vperm.slane %v1171_v3, 6 }
   0xd   : > { %v352_v4 = vshrl.u32 %v351_v1, 7  ;;  %1022 = vmatpush.bf16.msra.mxu2 %v978_v0  ;;  %1023 = vmatpush.bf16.msra.mxu3 %v978_v0  ;;  %s327_s22 = scalar_lea.vmem %s1563_s0, %s969_s17  ;;  %v1192_v13 = vperm.slane %v1171_v3, 4  ;;  %v1195_v14 = vperm.slane %v1171_v3, 7  ;;  %v478_v18 = vperm.slane %v1171_v3, 2  ;;  %v975_v33 = vld [vmem:[%s1568_s5 + $0x20] sm:$0xff]  ;;  %v974_v51 = vld [vmem:[%s1568_s5 + $0x18] sm:$0xff]  ;;  %s1538_s12 = scalar_lea.vmem %s1572_s9, %s969_s17 }
   0xe   : > { %v1189_v12 = vmul.f32 0.0, %v1174_v5  ;;  %v980_v15 = vld [vmem:[%s327_s22] sm:$0xff]   ;;  %v1015_v16 = vld [vmem:[%s327_s22 + $0x8] sm:$0xff]   ;;  %v1197_v17 = vld [vmem:[%s327_s22 + $0x10] sm:$0xff]   ;;  %v496_v23 = vperm.slane %v1171_v3, 5 }
   0xf   : > { %v361_v6 = vadd.s32 4294967295, %v352_v4  ;;  %v472_v9 = vadd.s32 1, %v352_v4  ;;  %v1200_v19 = vunpack.c.l.bf16 %v980_v15  ;;  %v1202_v20 = vunpack.c.h.bf16 %v980_v15  ;;  %v1206_v22 = vld [vmem:[%s327_s22 + $0x18] sm:$0xff]   ;;  %v1054_v42 = vld [vmem:[%s1564_s1 + $0x8] ss:$0 sm:$0xff]  ;;  %v973_v4 = vld [vmem:[%s1568_s5 + $0x10] sm:$0xff] }
  0x10   : > { %721 = vmatpush.bf16.msra.mxu0 %v977_v2  ;;  %1024 = vmatpush.bf16.msra.mxu1 %v977_v2  ;;  %v1204_v21 = vunpack.c.l.bf16 %v1015_v16  ;;  %v1210_v24 = vunpack.c.l.bf16 %v1197_v17  ;;  %v1213_v25 = vunpack.c.l.bf16 %v1206_v22  ;;  %v1219_v32 = vunpack.c.h.bf16 %v1015_v16 }
  0x11   : > { %vm362_vm0 = vcmp.ge.s32.totalorder %v361_v6, 0  ;;  %vm474_vm1 = vcmp.lt.s32.totalorder %v472_v9, 8  ;;  %1025 = vmatpush.bf16.msra.mxu2 %v977_v2  ;;  %1026 = vmatpush.bf16.msra.mxu3 %v977_v2  ;;  %v353_v29 = vrot.slane %v1200_v19, 7  ;;  %v354_v30 = vrot.slane %v1202_v20, 7 }
  0x12   : > { %v933_v27 = vsel %vm362_vm0, 1.0, %v1101_v26  ;;  %v934_v28 = vsel %vm474_vm1, 1.0, %v1101_v26  ;;  %v355_v34 = vrot.slane %v1204_v21, 7  ;;  %v415_v37 = vmul.f32 %v1200_v19, %v1174_v5 }
  0x13   : > { %v1217_v31 = vmul.f32 %v933_v27, %v367_v7  ;;  %v1225_v35 = vmul.f32 %v933_v27, %v377_v8  ;;  %v1227_v36 = vmul.f32 %v933_v27, %v395_v11  ;;  %v431_v40 = vmul.f32 %v1200_v19, %v1192_v13 }
  0x14   : > { %722 = vmatpush.bf16.msra.mxu0 %v976_v10  ;;  %1027 = vmatpush.bf16.msra.mxu1 %v976_v10  ;;  %v464_v41 = vrot.slane %v1200_v19, 1  ;;  %v432_v47 = vmul.f32 %v1202_v20, %v1192_v13  ;;  %v448_v48 = vmul.f32 %v1202_v20, %v1195_v14  ;;  %v449_v49 = vmul.f32 %v1204_v21, %v1195_v14 }
  0x15   : > { %1028 = vmatpush.bf16.msra.mxu2 %v976_v10  ;;  %1029 = vmatpush.bf16.msra.mxu3 %v976_v10  ;;  %v369_v38 = vmul.f32 0.0, %v1217_v31  ;;  %v370_v39 = vmul.f32 %v1217_v31, %v353_v29  ;;  %v379_v43 = vmul.f32 %v1225_v35, %v353_v29  ;;  %v380_v44 = vmul.f32 %v1225_v35, %v354_v30 }
  0x16   : > { %v397_v45 = vmul.f32 %v1227_v36, %v354_v30  ;;  %v398_v46 = vmul.f32 %v1227_v36, %v355_v34  ;;  %v465_v50 = vrot.slane %v1202_v20, 1  ;;  %v466_v54 = vrot.slane %v1204_v21, 1 }
  0x17   : > { %v387_v52 = vadd.f32 %v379_v43, %v369_v38  ;;  %v388_v53 = vadd.f32 %v380_v44, %v370_v39  ;;  %v1254_v55 = vmul.f32 %v934_v28, %v478_v18  ;;  %v1256_v56 = vmul.f32 %v934_v28, %v496_v23 }
  0x18   : > { %723 = vmatpush.bf16.msra.mxu0 %v975_v33  ;;  %1030 = vmatpush.bf16.msra.mxu1 %v975_v33  ;;  %v1258_v57 = vmul.f32 %v1054_v42, %v934_v28  ;;  %v1261_v58 = vrot.slane %v1219_v32, 7  ;;  %v1264_v59 = vrot.slane %v1210_v24, 7  ;;  %v371_v63 = vmul.f32 %v1217_v31, %v354_v30 }
  0x19   : > { %1031 = vmatpush.bf16.msra.mxu2 %v975_v33  ;;  %1032 = vmatpush.bf16.msra.mxu3 %v975_v33  ;;  %v405_v60 = vadd.f32 %v397_v45, %v387_v52  ;;  %v406_v61 = vadd.f32 %v398_v46, %v388_v53  ;;  %v481_v62 = vmul.f32 %v1254_v55, %v464_v41  ;;  %v480_v8 = vmul.f32 0.0, %v1254_v55  ;;  %v972_v33 = vld [vmem:[%s1568_s5 + $0x8] sm:$0xff]  ;;  %v971_v52 = vld [vmem:[%s1568_s5] sm:$0xff] }
  0x1a   : > { %v498_v0 = vmul.f32 %v1256_v56, %v464_v41  ;;  %v499_v1 = vmul.f32 %v1256_v56, %v465_v50  ;;  %v516_v2 = vmul.f32 %v1258_v57, %v465_v50  ;;  %v517_v3 = vmul.f32 %v1258_v57, %v466_v54 }
  0x1b   : > { %v422_v6 = vadd.f32 %v1189_v12, %v405_v60  ;;  %v423_v7 = vadd.f32 %v415_v37, %v406_v61  ;;  %v372_v9 = vmul.f32 %v1217_v31, %v355_v34  ;;  %v381_v10 = vmul.f32 %v1225_v35, %v355_v34  ;;  %v1318_v61 = vld [vmem:[%s1565_s2] ss:$0 sm:$0xff] }
  0x1c   : > { %724 = vmatpush.bf16.msra.mxu0 %v974_v51  ;;  %1033 = vmatpush.bf16.msra.mxu1 %v974_v51  ;;  %v382_v11 = vmul.f32 %v1225_v35, %v1261_v58  ;;  %v399_v15 = vmul.f32 %v1227_v36, %v1261_v58  ;;  %v1284_v16 = vrot.slane %v1219_v32, 1  ;;  %v400_v23 = vmul.f32 %v1227_v36, %v1264_v59 }
  0x1d   : > { %1034 = vmatpush.bf16.msra.mxu2 %v974_v51  ;;  %1035 = vmatpush.bf16.msra.mxu3 %v974_v51  ;;  %v439_v18 = vadd.f32 %v431_v40, %v422_v6  ;;  %v440_v12 = vadd.f32 %v432_v47, %v423_v7  ;;  %v416_v26 = vmul.f32 %v1202_v20, %v1174_v5  ;;  %v1300_v39 = vunpack.c.h.bf16 %v1197_v17 }
  0x1e   : > { %v389_v27 = vadd.f32 %v381_v10, %v371_v63  ;;  %v390_v28 = vadd.f32 %v382_v11, %v372_v9  ;;  %v417_v29 = vmul.f32 %v1204_v21, %v1174_v5  ;;  %v433_v30 = vmul.f32 %v1204_v21, %v1192_v13 }
  0x1f   : > { %v456_v34 = vadd.f32 %v448_v48, %v439_v18  ;;  %v457_v37 = vadd.f32 %v449_v49, %v440_v12  ;;  %v434_v38 = vmul.f32 %v1219_v32, %v1192_v13  ;;  %v450_v42 = vmul.f32 %v1219_v32, %v1195_v14 }
  0x20   : > { %725 = vmatpush.bf16.msra.mxu0 %v973_v4  ;;  %1036 = vmatpush.bf16.msra.mxu1 %v973_v4  ;;  %v407_v40 = vadd.f32 %v399_v15, %v389_v27  ;;  %v408_v41 = vadd.f32 %v400_v23, %v390_v28  ;;  %v1305_v43 = vrot.slane %v1210_v24, 1  ;;  %v451_v46 = vmul.f32 %v1210_v24, %v1195_v14 }
  0x21   : > { %1037 = vmatpush.bf16.msra.mxu2 %v973_v4  ;;  %1038 = vmatpush.bf16.msra.mxu3 %v973_v4  ;;  %v488_v44 = vadd.f32 %v480_v8, %v456_v34  ;;  %v489_v45 = vadd.f32 %v481_v62, %v457_v37  ;;  %v482_v47 = vmul.f32 %v1254_v55, %v465_v50  ;;  %v1323_v62 = vrot.slane %v1300_v39, 7 }
  0x22   : > { %v424_v48 = vadd.f32 %v416_v26, %v407_v40  ;;  %v425_v17 = vadd.f32 %v417_v29, %v408_v41  ;;  %v483_v49 = vmul.f32 %v1254_v55, %v466_v54  ;;  %v500_v51 = vmul.f32 %v1256_v56, %v466_v54 }
  0x23   : > { %v506_v53 = vadd.f32 %v498_v0, %v488_v44  ;;  %v507_v60 = vadd.f32 %v499_v1, %v489_v45  ;;  %v501_v50 = vmul.f32 %v1256_v56, %v1284_v16  ;;  %v518_v4 = vmul.f32 %v1258_v57, %v1284_v16 }
  0x24   : > { %726 = vmatpush.bf16.msra.mxu0 %v972_v33  ;;  %1039 = vmatpush.bf16.msra.mxu1 %v972_v33  ;;  %v441_v54 = vadd.f32 %v433_v30, %v424_v48  ;;  %v442_v63 = vadd.f32 %v434_v38, %v425_v17  ;;  %v519_v6 = vmul.f32 %v1258_v57, %v1305_v43  ;;  %v1343_v26 = vrot.slane %v1300_v39, 1 }
  0x25   : > { %1040 = vmatpush.bf16.msra.mxu2 %v972_v33  ;;  %1041 = vmatpush.bf16.msra.mxu3 %v972_v33  ;;  %v524_v0 = vadd.f32 %v516_v2, %v506_v53  ;;  %v525_v1 = vadd.f32 %v517_v3, %v507_v60  ;;  %v373_v7 = vmul.f32 %v1217_v31, %v1261_v58  ;;  %v1338_v3 = vrot.slane %v1213_v25, 7 }
  0x26   : > { %v458_v8 = vadd.f32 %v450_v42, %v441_v54  ;;  %v459_v9 = vadd.f32 %v451_v46, %v442_v63  ;;  %v374_v10 = vmul.f32 %v1217_v31, %v1264_v59  ;;  %v383_v11 = vmul.f32 %v1225_v35, %v1264_v59 }
  0x27   : > { %v536_v15 = vadd.f32 %v1318_v61, %v524_v0  ;;  %v537_v2 = vadd.f32 %v1318_v61, %v525_v1  ;;  %v384_v58 = vmul.f32 %v1225_v35, %v1323_v62  ;;  %v1346_v28 = vrot.slane %v1213_v25, 1 }
  0x28   : > { %727 = vmatpush.bf16.msra.mxu0 %v971_v52  ;;  %1042 = vmatpush.bf16.msra.mxu1 %v971_v52  ;;  %v490_v18 = vadd.f32 %v482_v47, %v458_v8  ;;  %v491_v12 = vadd.f32 %v483_v49, %v459_v9  ;;  %v391_v23 = vadd.f32 %v383_v11, %v373_v7  ;;  %v1349_v29 = vunpack.c.h.bf16 %v1206_v22 }
  0x29   : > { %1043 = vmatpush.bf16.msra.mxu2 %v971_v52  ;;  %1044 = vmatpush.bf16.msra.mxu3 %v971_v52  ;;  %v552_v59 = vmul.f32 0.044715, %v536_v15  ;;  %v553_v27 = vmul.f32 0.044715, %v537_v2  ;;  %v392_v34 = vadd.f32 %v384_v58, %v374_v10  ;;  %v401_v37 = vmul.f32 %v1227_v36, %v1323_v62 }
  0x2a   : > { %v508_v30 = vadd.f32 %v500_v51, %v490_v18  ;;  %v509_v33 = vadd.f32 %v501_v50, %v491_v12  ;;  %v402_v41 = vmul.f32 %v1227_v36, %v1338_v3  ;;  %v418_v42 = vmul.f32 %v1219_v32, %v1174_v5 }
  0x2b   : > { %v560_v38 = vmul.f32 %v552_v59, %v536_v15  ;;  %v561_v40 = vmul.f32 %v553_v27, %v537_v2  ;;  %v409_v46 = vadd.f32 %v401_v37, %v391_v23  ;;  %v419_v22 = vmul.f32 %v1210_v24, %v1174_v5 }
  0x2c   : > { %v526_v44 = vadd.f32 %v518_v4, %v508_v30  ;;  %v527_v45 = vadd.f32 %v519_v6, %v509_v33  ;;  %v410_v17 = vadd.f32 %v402_v41, %v392_v34  ;;  %v435_v49 = vmul.f32 %v1210_v24, %v1192_v13 }
  0x2d   : > { %v568_v47 = vmul.f32 %v560_v38, %v536_v15  ;;  %v569_v48 = vmul.f32 %v561_v40, %v537_v2  ;;  %v426_v53 = vadd.f32 %v418_v42, %v409_v46  ;;  %v436_v60 = vmul.f32 %v1300_v39, %v1192_v13 }
  0x2e   : > { %v1362_v51 = vadd.f32 %v1318_v61, %v526_v44  ;;  %v1365_v52 = vadd.f32 %v1318_v61, %v527_v45  ;;  %v427_v63 = vadd.f32 %v419_v22, %v410_v17  ;;  %v452_v4 = vmul.f32 %v1300_v39, %v1195_v14 }
  0x2f   : > { %v576_v50 = vadd.f32 %v568_v47, %v536_v15  ;;  %v577_v54 = vadd.f32 %v569_v48, %v537_v2  ;;  %v544_v0 = vmul.f32 0.5, %v536_v15  ;;  %v545_v1 = vmul.f32 0.5, %v537_v2 }
  0x30   : > { %v554_v6 = vmul.f32 0.044715, %v1362_v51  ;;  %v555_v7 = vmul.f32 0.044715, %v1365_v52  ;;  %v443_v10 = vadd.f32 %v435_v49, %v426_v53  ;;  %v444_v11 = vadd.f32 %v436_v60, %v427_v63 }
  0x31   : > { %v584_v8 = vmul.f32 0.7978846, %v576_v50  ;;  %v585_v9 = vmul.f32 0.7978846, %v577_v54  ;;  %v453_v12 = vmul.f32 %v1213_v25, %v1195_v14  ;;  %v484_v23 = vmul.f32 %v1254_v55, %v1284_v16 }
  0x32   : > { %v562_v58 = vmul.f32 %v554_v6, %v1362_v51  ;;  %v563_v18 = vmul.f32 %v555_v7, %v1365_v52  ;;  %v460_v15 = vadd.f32 %v452_v4, %v443_v10  ;;  %v485_v2 = vmul.f32 %v1254_v55, %v1305_v43 }
  0x33   : > { %1061 = vtanh.f32 %v584_v8  ;;  %v502_v59 = vmul.f32 %v1256_v56, %v1305_v43  ;;  %v461_v33 = vadd.f32 %v453_v12, %v444_v11  ;;  %v503_v37 = vmul.f32 %v1256_v56, %v1343_v26 }
  0x34   : > { %1063 = vtanh.f32 %v585_v9  ;;  %v570_v27 = vmul.f32 %v562_v58, %v1362_v51  ;;  %v571_v30 = vmul.f32 %v563_v18, %v1365_v52  ;;  %v492_v34 = vadd.f32 %v484_v23, %v460_v15 }
  0x35   : > { %v520_v16 = vmul.f32 %v1258_v57, %v1343_v26  ;;  %v521_v38 = vmul.f32 %v1258_v57, %v1346_v28  ;;  %v493_v41 = vadd.f32 %v485_v2, %v461_v33  ;;  %v360_v42 = vrot.slane %v1349_v29, 7 }
  0x36   : > { %v578_v40 = vadd.f32 %v570_v27, %v1362_v51  ;;  %v579_v43 = vadd.f32 %v571_v30, %v1365_v52  ;;  %v510_v44 = vadd.f32 %v502_v59, %v492_v34  ;;  %v375_v45 = vmul.f32 %v1217_v31, %v1323_v62 }
  0x37   : > { %v376_v46 = vmul.f32 %v1217_v31, %v1338_v3  ;;  %v385_v22 = vmul.f32 %v1225_v35, %v1338_v3  ;;  %v511_v17 = vadd.f32 %v503_v37, %v493_v41  ;;  %v386_v49 = vmul.f32 %v1225_v35, %v360_v42  ;;  %v1406_v31 = vld [vmem:[%s1566_s3] ss:$0 sm:$0xff] }
  0x38   : > { %v586_v47 = vmul.f32 0.7978846, %v578_v40  ;;  %v587_v48 = vmul.f32 0.7978846, %v579_v43  ;;  %v528_v60 = vadd.f32 %v520_v16, %v510_v44  ;;  %v403_v54 = vmul.f32 %v1227_v36, %v360_v42 }
  0x39   : > { %v1062_v53 = vpop.eup %1061  ;;  %v393_v50 = vadd.f32 %v385_v22, %v375_v45  ;;  %v404_v63 = vmul.f32 0.0, %v1227_v36  ;;  %v529_v3 = vadd.f32 %v521_v38, %v511_v17  ;;  %v394_v6 = vadd.f32 %v386_v49, %v376_v46  ;;  %v1414_v36 = vld [vmem:[%s1567_s4] ss:$0 sm:$0xff] }
  0x3a   : > { %v1064_v4 = vpop.eup %1063  ;;  %v600_v62 = vadd.f32 1.0, %v1062_v53  ;;  %1065 = vtanh.f32 %v586_v47  ;;  %v1409_v35 = vadd.f32 %v1318_v61, %v528_v60  ;;  %v420_v58 = vmul.f32 %v1300_v39, %v1174_v5 }
  0x3b   : > { %v601_v7 = vadd.f32 1.0, %v1064_v4  ;;  %1067 = vtanh.f32 %v587_v48  ;;  %v411_v8 = vadd.f32 %v403_v54, %v393_v50  ;;  %v1417_v10 = vadd.f32 %v1318_v61, %v529_v3 }
  0x3c   : > { %v608_v9 = vmul.f32 %v600_v62, %v544_v0  ;;  %v412_v11 = vadd.f32 %v404_v63, %v394_v6  ;;  %v546_v12 = vmul.f32 0.5, %v1362_v51  ;;  %v556_v23 = vmul.f32 0.044715, %v1409_v35 }
  0x3d   : > { %v609_v18 = vmul.f32 %v601_v7, %v545_v1  ;;  %v421_v0 = vmul.f32 %v1213_v25, %v1174_v5  ;;  %v547_v2 = vmul.f32 0.5, %v1365_v52  ;;  %v557_v59 = vmul.f32 0.044715, %v1417_v10 }
  0x3e   : > { %v620_v15 = vmul.f32 %v1406_v31, %v608_v9  ;;  %v428_v27 = vadd.f32 %v420_v58, %v411_v8  ;;  %v564_v33 = vmul.f32 %v556_v23, %v1409_v35  ;;  %v437_v51 = vmul.f32 %v1213_v25, %v1192_v13 }
  0x3f   : > { %v621_v30 = vmul.f32 %v1406_v31, %v609_v18  ;;  %v429_v34 = vadd.f32 %v421_v0, %v412_v11  ;;  %v565_v5 = vmul.f32 %v557_v59, %v1417_v10  ;;  %v438_v16 = vmul.f32 %v1349_v29, %v1192_v13 }
  0x40   : > { %v1066_v1 = vpop.eup %1065  ;;  %v632_v37 = vadd.f32 %v1414_v36, %v620_v15  ;;  %v454_v52 = vmul.f32 %v1349_v29, %v1195_v14  ;;  %v572_v41 = vmul.f32 %v564_v33, %v1409_v35  ;;  %v445_v42 = vadd.f32 %v437_v51, %v428_v27 }
  0x41   : > { %v1068_v38 = vpop.eup %1067  ;;  %v633_v40 = vadd.f32 %v1414_v36, %v621_v30  ;;  %v602_v43 = vadd.f32 1.0, %v1066_v1  ;;  %v573_v46 = vmul.f32 %v565_v5, %v1417_v10  ;;  %v446_v22 = vadd.f32 %v438_v16, %v429_v34 }
  0x42   : > { %v1441_v44 = vadd.f32 %v1200_v19, %v632_v37  ;;  %v603_v45 = vadd.f32 1.0, %v1068_v38  ;;  %v580_v48 = vadd.f32 %v572_v41, %v1409_v35  ;;  %v455_v17 = vmul.f32 0.0, %v1195_v14 }
  0x43   : > { %v1445_v47 = vadd.f32 %v1202_v20, %v633_v40  ;;  %v610_v13 = vmul.f32 %v602_v43, %v546_v12  ;;  %v581_v53 = vadd.f32 %v573_v46, %v1417_v10  ;;  %v462_v60 = vadd.f32 %v454_v52, %v445_v42 }
  0x44   : > { %v611_v49 = vmul.f32 %v603_v45, %v547_v2  ;;  %v471_v50 = vrot.slane %v1349_v29, 1  ;;  %v588_v63 = vmul.f32 0.7978846, %v580_v48  ;;  %v463_v4 = vadd.f32 %v455_v17, %v446_v22 }
  0x45   : > { %v648_v19 = vpack.c.bf16 %v1445_v47, %v1441_v44  ;;  %v622_v54 = vmul.f32 %v1406_v31, %v610_v13  ;;  %v589_v62 = vmul.f32 0.7978846, %v581_v53  ;;  %v486_v3 = vmul.f32 %v1254_v55, %v1343_v26 }
  0x46   : > { %v623_v20 = vmul.f32 %v1406_v31, %v611_v49  ;;  %v487_v14 = vmul.f32 %v1254_v55, %v1346_v28  ;;  %1069 = vtanh.f32 %v588_v63  ;;  %v504_v7 = vmul.f32 %v1256_v56, %v1346_v28 }
  0x47   : > { %728 = vmatmul.bf16.vlgmr.msra.gmra.mxu0 %v648_v19  ;;  %v634_v6 = vadd.f32 %v1414_v36, %v622_v54  ;;  %v505_v8 = vmul.f32 %v1256_v56, %v471_v50  ;;  %1071 = vtanh.f32 %v589_v62  ;;  %v494_v11 = vadd.f32 %v486_v3, %v462_v60 }
  0x48   : > { %v635_v9 = vadd.f32 %v1414_v36, %v623_v20  ;;  %v495_v58 = vadd.f32 %v487_v14, %v463_v4  ;;  %v522_v26 = vmul.f32 %v1258_v57, %v471_v50  ;;  %v523_v55 = vmul.f32 0.0, %v1258_v57  ;;  %v1505_v14 = vld [vmem:[%s1569_s6] ss:$0 sm:$0xff] }
  0x49   : > { %v1465_v18 = vadd.f32 %v1204_v21, %v634_v6  ;;  %v512_v23 = vadd.f32 %v504_v7, %v494_v11  ;;  %v548_v28 = vmul.f32 0.5, %v1409_v35  ;;  %v549_v21 = vmul.f32 0.5, %v1417_v10 }
  0x4a   : > { %v1470_v12 = vadd.f32 %v1219_v32, %v635_v9  ;;  %v513_v0 = vadd.f32 %v505_v8, %v495_v58 }
  0x4b   : > { %v530_v15 = vadd.f32 %v522_v26, %v512_v23 }
  0x4c   : > { %v649_v56 = vpack.c.bf16 %v1470_v12, %v1465_v18  ;;  %v531_v2 = vadd.f32 %v523_v55, %v513_v0  ;;  %v1070_v59 = vpop.eup %1069 }
  0x4d   : > { %v1072_v27 = vpop.eup %1071  ;;  %v604_v30 = vadd.f32 1.0, %v1070_v59  ;;  %v542_v57 = vadd.f32 %v1318_v61, %v530_v15 }
  0x4e   : > { %733 = vmatmul.bf16.vlgmr.msra.gmra.mxu1 %v649_v56  ;;  %v543_v32 = vadd.f32 %v1318_v61, %v531_v2  ;;  %v605_v33 = vadd.f32 1.0, %v1072_v27 }
  0x4f   : > { %v612_v34 = vmul.f32 %v604_v30, %v548_v28  ;;  %v558_v51 = vmul.f32 0.044715, %v542_v57  ;;  %v550_v48 = vmul.f32 0.5, %v542_v57 }
  0x50   : > { %v613_v1 = vmul.f32 %v605_v33, %v549_v21  ;;  %v559_v37 = vmul.f32 0.044715, %v543_v32  ;;  %v551_v49 = vmul.f32 0.5, %v543_v32 }
  0x51   : > { %v624_v5 = vmul.f32 %v1406_v31, %v612_v34  ;;  %v566_v35 = vmul.f32 %v558_v51, %v542_v57 }
  0x52   : > { %v625_v16 = vmul.f32 %v1406_v31, %v613_v1  ;;  %v567_v52 = vmul.f32 %v559_v37, %v543_v32 }
  0x53   : > { %v636_v10 = vadd.f32 %v1414_v36, %v624_v5  ;;  %v574_v38 = vmul.f32 %v566_v35, %v542_v57 }
  0x54   : > { %v637_v40 = vadd.f32 %v1414_v36, %v625_v16  ;;  %v575_v43 = vmul.f32 %v567_v52, %v543_v32 }
  0x55   : > { %v1483_v41 = vadd.f32 %v1210_v24, %v636_v10  ;;  %v582_v61 = vadd.f32 %v574_v38, %v542_v57 }
  0x56   : > { %v1486_v42 = vadd.f32 %v1300_v39, %v637_v40  ;;  %v583_v45 = vadd.f32 %v575_v43, %v543_v32 }
  0x57   : > { %v590_v46 = vmul.f32 0.7978846, %v582_v61 }
  0x58   : > { %v650_v22 = vpack.c.bf16 %v1486_v42, %v1483_v41  ;;  %v591_v13 = vmul.f32 0.7978846, %v583_v45  ;;  %v1515_v45 = vld [vmem:[%s1570_s7] ss:$0 sm:$0xff] }
  0x59   : > { %1073 = vtanh.f32 %v590_v46 }
  0x5a   : > { %738 = vmatmul.bf16.vlgmr.msra.gmra.mxu2 %v650_v22  ;;  %1075 = vtanh.f32 %v591_v13 }
  0x5f   : > { %v1074_v17 = vpop.eup %1073 }
  0x60   : > { %v1076_v53 = vpop.eup %1075  ;;  %v606_v60 = vadd.f32 1.0, %v1074_v17 }
  0x61   : > { %v607_v24 = vadd.f32 1.0, %v1076_v53 }
  0x62   : > { %v614_v50 = vmul.f32 %v606_v60, %v550_v48 }
  0x63   : > { %v615_v19 = vmul.f32 %v607_v24, %v551_v49  ;;  %v1521_v24 = vld [vmem:[%s1571_s8] ss:$0 sm:$0xff] }
  0x64   : > { %v626_v39 = vmul.f32 %v1406_v31, %v614_v50 }
  0x65   : > { %v627_v54 = vmul.f32 %v1406_v31, %v615_v19 }
  0x66   : > { %v638_v63 = vadd.f32 %v1414_v36, %v626_v39 }
  0x67   : > { %v639_v4 = vadd.f32 %v1414_v36, %v627_v54 }
  0x68   : > { %v1495_v20 = vadd.f32 %v1213_v25, %v638_v63 }
  0x69   : > { %v1498_v62 = vadd.f32 %v1349_v29, %v639_v4 }
  0x6b   : > { %v651_v3 = vpack.c.bf16 %v1498_v62, %v1495_v20 }
  0x6d   : > { %743 = vmatmul.bf16.vlgmr.msra.gmra.mxu3 %v651_v3 }
  0xc4   : > { %v729_v31 = vpop.f32.mrf.mxu0 }
  0xc5   : > { %v730_v6 = vadd.f32 %v1505_v14, %v729_v31 }
  0xc7   : > { %v757_v7 = vmul.f32 0.044715, %v730_v6  ;;  %v749_v38 = vmul.f32 0.5, %v730_v6 }
  0xc9   : > { %v765_v36 = vmul.f32 %v757_v7, %v730_v6 }
  0xcb   : > { %v773_v8 = vmul.f32 %v765_v36, %v730_v6  ;;  %v734_v25 = vpop.f32.mrf.mxu1 }
  0xcc   : > { %v735_v9 = vadd.f32 %v1505_v14, %v734_v25  ;;  %v731_v23 = vpop.f32.mrf.mxu0 }
  0xcd   : > { %v781_v29 = vadd.f32 %v773_v8, %v730_v6  ;;  %v732_v28 = vadd.f32 %v1505_v14, %v731_v23 }
  0xce   : > { %v759_v11 = vmul.f32 0.044715, %v735_v9  ;;  %v751_v43 = vmul.f32 0.5, %v735_v9 }
  0xcf   : > { %v789_v26 = vmul.f32 0.7978846, %v781_v29  ;;  %v758_v59 = vmul.f32 0.044715, %v732_v28  ;;  %v750_v17 = vmul.f32 0.5, %v732_v28 }
  0xd0   : > { %v767_v58 = vmul.f32 %v759_v11, %v735_v9 }
  0xd1   : > { %1077 = vtanh.f32 %v789_v26  ;;  %v766_v27 = vmul.f32 %v758_v59, %v732_v28 }
  0xd2   : > { %v775_v55 = vmul.f32 %v767_v58, %v735_v9 }
  0xd3   : > { %v736_v0 = vpop.f32.mrf.mxu1  ;;  %v774_v57 = vmul.f32 %v766_v27, %v732_v28 }
  0xd4   : > { %v783_v56 = vadd.f32 %v775_v55, %v735_v9  ;;  %v737_v15 = vadd.f32 %v1505_v14, %v736_v0 }
  0xd5   : > { %v782_v34 = vadd.f32 %v774_v57, %v732_v28 }
  0xd6   : > { %v791_v2 = vmul.f32 0.7978846, %v783_v56  ;;  %v760_v21 = vmul.f32 0.044715, %v737_v15  ;;  %v752_v63 = vmul.f32 0.5, %v737_v15 }
  0xd7   : > { %v1078_v33 = vpop.eup %1077  ;;  %v790_v5 = vmul.f32 0.7978846, %v782_v34 }
  0xd8   : > { %1079 = vtanh.f32 %v791_v2  ;;  %v768_v30 = vmul.f32 %v760_v21, %v737_v15  ;;  %v805_v35 = vadd.f32 1.0, %v1078_v33 }
  0xd9   : > { %1081 = vtanh.f32 %v790_v5 }
  0xda   : > { %v776_v32 = vmul.f32 %v768_v30, %v737_v15  ;;  %v813_v61 = vmul.f32 %v805_v35, %v749_v38 }
  0xdc   : > { %v784_v51 = vadd.f32 %v776_v32, %v737_v15  ;;  %v825_v60 = vmul.f32 %v1515_v45, %v813_v61 }
  0xdd   : > { %v739_v37 = vpop.f32.mrf.mxu2 }
  0xde   : > { %v1080_v1 = vpop.eup %1079  ;;  %v740_v16 = vadd.f32 %v1505_v14, %v739_v37  ;;  %v792_v52 = vmul.f32 0.7978846, %v784_v51  ;;  %v837_v36 = vadd.f32 %v1521_v24, %v825_v60 }
  0xdf   : > { %v807_v10 = vadd.f32 1.0, %v1080_v1  ;;  %v1082_v48 = vpop.eup %1081 }
  0xe0   : > { %v761_v40 = vmul.f32 0.044715, %v740_v16  ;;  %1083 = vtanh.f32 %v792_v52  ;;  %v806_v19 = vadd.f32 1.0, %v1082_v48  ;;  %v845_v55 = vadd.f32 %v837_v36, %v1441_v44 }
  0xe1   : > { %v815_v22 = vmul.f32 %v807_v10, %v751_v43  ;;  %v753_v30 = vmul.f32 0.5, %v740_v16 }
  0xe2   : > { %v769_v46 = vmul.f32 %v761_v40, %v740_v16  ;;  %v814_v31 = vmul.f32 %v806_v19, %v750_v17 }
  0xe3   : > { %v827_v54 = vmul.f32 %v1515_v45, %v815_v22 }
  0xe4   : > { %v777_v13 = vmul.f32 %v769_v46, %v740_v16  ;;  %v826_v8 = vmul.f32 %v1515_v45, %v814_v31 }
  0xe5   : > { %v741_v49 = vpop.f32.mrf.mxu2  ;;  %v839_v9 = vadd.f32 %v1521_v24, %v827_v54 }
  0xe6   : > { %v1084_v53 = vpop.eup %1083  ;;  %v785_v50 = vadd.f32 %v777_v13, %v740_v16  ;;  %v742_v39 = vadd.f32 %v1505_v14, %v741_v49  ;;  %v838_v11 = vadd.f32 %v1521_v24, %v826_v8 }
  0xe7   : > { %v808_v4 = vadd.f32 1.0, %v1084_v53  ;;  %v847_v56 = vadd.f32 %v839_v9, %v1465_v18 }
  0xe8   : > { %v793_v3 = vmul.f32 0.7978846, %v785_v50  ;;  %v762_v6 = vmul.f32 0.044715, %v742_v39  ;;  %v846_v23 = vadd.f32 %v838_v11, %v1445_v47  ;;  %v754_v18 = vmul.f32 0.5, %v742_v39 }
  0xe9   : > { %v816_v7 = vmul.f32 %v808_v4, %v752_v63 }
  0xea   : > { %1085 = vtanh.f32 %v793_v3  ;;  %v770_v25 = vmul.f32 %v762_v6, %v742_v39  ;;  %v998_v59 = vpack.c.bf16 %v846_v23, %v845_v55 }
  0xeb   : > { %v828_v29 = vmul.f32 %v1515_v45, %v816_v7 }
  0xec   : > { %v778_v58 = vmul.f32 %v770_v25, %v742_v39  ;;  %999 = vst [vmem:[%s1538_s12] sm:$0xff] %v998_v59  }
  0xed   : > { %v840_v26 = vadd.f32 %v1521_v24, %v828_v29 }
  0xee   : > { %v786_v0 = vadd.f32 %v778_v58, %v742_v39 }
  0xef   : > { %v848_v28 = vadd.f32 %v840_v26, %v1470_v12 }
  0xf0   : > { %v1086_v15 = vpop.eup %1085  ;;  %v744_v2 = vpop.f32.mrf.mxu3  ;;  %v794_v21 = vmul.f32 0.7978846, %v786_v0 }
  0xf1   : > { %v809_v44 = vadd.f32 1.0, %v1086_v15  ;;  %v745_v47 = vadd.f32 %v1505_v14, %v744_v2  ;;  %v1003_v27 = vpack.c.bf16 %v848_v28, %v847_v56 }
  0xf2   : > { %1087 = vtanh.f32 %v794_v21 }
  0xf3   : > { %v763_v57 = vmul.f32 0.044715, %v745_v47  ;;  %1018 = vst [vmem:[%s1538_s12 + $0x8] sm:$0xff] %v1003_v27   ;;  %v817_v32 = vmul.f32 %v809_v44, %v753_v30  ;;  %v755_v60 = vmul.f32 0.5, %v745_v47 }
  0xf5   : > { %v771_v33 = vmul.f32 %v763_v57, %v745_v47  ;;  %v829_v12 = vmul.f32 %v1515_v45, %v817_v32 }
  0xf7   : > { %v779_v34 = vmul.f32 %v771_v33, %v745_v47  ;;  %v841_v16 = vadd.f32 %v1521_v24, %v829_v12 }
  0xf8   : > { %v1088_v51 = vpop.eup %1087  ;;  %v746_v1 = vpop.f32.mrf.mxu3 }
  0xf9   : > { %v787_v37 = vadd.f32 %v779_v34, %v745_v47  ;;  %v810_v5 = vadd.f32 1.0, %v1088_v51  ;;  %v747_v35 = vadd.f32 %v1505_v14, %v746_v1  ;;  %v849_v22 = vadd.f32 %v841_v16, %v1483_v41 }
  0xfb   : > { %v795_v52 = vmul.f32 0.7978846, %v787_v37  ;;  %v818_v10 = vmul.f32 %v810_v5, %v754_v18  ;;  %v764_v38 = vmul.f32 0.044715, %v747_v35  ;;  %v756_v54 = vmul.f32 0.5, %v747_v35 }
  0xfd   : > { %1089 = vtanh.f32 %v795_v52  ;;  %v830_v40 = vmul.f32 %v1515_v45, %v818_v10  ;;  %v772_v43 = vmul.f32 %v764_v38, %v747_v35 }
  0xff   : > { %v842_v61 = vadd.f32 %v1521_v24, %v830_v40  ;;  %v780_v46 = vmul.f32 %v772_v43, %v747_v35 }
 0x101   : > { %v850_v13 = vadd.f32 %v842_v61, %v1486_v42  ;;  %v788_v48 = vadd.f32 %v780_v46, %v747_v35 }
 0x103   : > { %v1090_v17 = vpop.eup %1089  ;;  %v1008_v14 = vpack.c.bf16 %v850_v13, %v849_v22  ;;  %v796_v49 = vmul.f32 0.7978846, %v788_v48 }
 0x104   : > { %v811_v53 = vadd.f32 1.0, %v1090_v17 }
 0x105   : > { %1019 = vst [vmem:[%s1538_s12 + $0x10] sm:$0xff] %v1008_v14   ;;  %1091 = vtanh.f32 %v796_v49 }
 0x106   : > { %v819_v50 = vmul.f32 %v811_v53, %v755_v60 }
 0x108   : > { %v831_v39 = vmul.f32 %v1515_v45, %v819_v50 }
 0x10a   : > { %v843_v41 = vadd.f32 %v1521_v24, %v831_v39 }
 0x10b   : > { %v1092_v19 = vpop.eup %1091 }
 0x10c   : > { %v812_v63 = vadd.f32 1.0, %v1092_v19  ;;  %v851_v31 = vadd.f32 %v843_v41, %v1495_v20 }
 0x10e   : > { %v820_v4 = vmul.f32 %v812_v63, %v756_v54 }
 0x110   : > { %v832_v42 = vmul.f32 %v1515_v45, %v820_v4 }
 0x112   : > { %v844_v3 = vadd.f32 %v1521_v24, %v832_v42 }
 0x114   : > { %v852_v6 = vadd.f32 %v844_v3, %v1498_v62 }
 0x116   : > { %v1013_v7 = vpack.c.bf16 %v852_v6, %v851_v31 }
 0x118   : > { %1020 = vst [vmem:[%s1538_s12 + $0x18] sm:$0xff] %v1013_v7  }
 0x119 PF: > { %s19_s30 = sadd.s32 1, %s1099_s30  }
 0x11a   : > { %p16_p4 = scmp.ge.s32.totalorder %s19_s30, 4  }
 0x11c   :  { %18 = sbr.rel (!%p16_p4) target bundleno = 1 (0x1), region = 86 }

// kernel: convmixer_forward.6
= control target key start
LH: loop header
LB: loop body
LE: loop exit
PB: predicated region body
PF: predicated region fallthrough
CT: control target
= control target key end

     0   :  { %s1244_s13 = smov 0   ;;  %s1659_s0 = inlined_call_operand.vmem [shape: bf16[2,8,8,128], index: 0, kind: input, shape index: {}, may-alias: {0,9}]   ;;  %s1660_s1 = inlined_call_operand.vmem [shape: f32[9,128], index: 1, kind: input, shape index: {}]   ;;  %s1661_s2 = inlined_call_operand.vmem [shape: f32[1,128], index: 2, kind: input, shape index: {}]   ;;  %s1662_s3 = inlined_call_operand.vmem [shape: f32[1,128], index: 3, kind: input, shape index: {}]   ;;  %s1663_s4 = inlined_call_operand.vmem [shape: f32[1,128], index: 4, kind: input, shape index: {}]   ;;  %s1664_s5 = inlined_call_operand.vmem [shape: bf16[128,128], index: 5, kind: input, shape index: {}]   ;;  %s1665_s6 = inlined_call_operand.vmem [shape: f32[1,128], index: 6, kind: input, shape index: {}]   ;;  %s1666_s7 = inlined_call_operand.vmem [shape: f32[1,128], index: 7, kind: input, shape index: {}]   ;;  %s1667_s8 = inlined_call_operand.vmem [shape: f32[1,128], index: 8, kind: input, shape index: {}]   ;;  %s1668_s9 = inlined_call_operand.vmem [shape: bf16[2,8,8,128], index: 9, kind: output, shape index: {0}, may-alias: {0,9}]   ;;  %s1669_s10 = inlined_call_operand.vmem [shape: f32[2,1,128], index: 10, kind: output, shape index: {1}]  }
   0x1 LB: > { %s1007_s14 = sadd.s32 4294967295, %s1185_s13   ;;  %p1011_p0 = scmp.ge.s32.totalorder %s1185_s13, 1  ;;  %s1185_s13 = sphi %s1244_s13, %s21_s13  }
   0x2   : > { %p315_p1 = scmp.lt.s32.totalorder %s1185_s13, 3 }
   0x4   : > { %p316_p2 = pnand %p1011_p0, %p315_p1 }
   0x5   : > { %p356_p3 = scmp.lt.s32.totalorder (!%p316_p2), %s1007_s14, 1 }
   0x6   : > { %319 = sbr.rel (%p316_p2) target bundleno = 295 (0x127), region = 56 }
   0xb   : > { %v1061_v0 = vld [vmem:[%s1664_s5 + $0x38] sm:$0xff]  ;;  %v387_v1 = vlaneseq  ;;  %v1060_v2 = vld [vmem:[%s1664_s5 + $0x30] sm:$0xff]  ;;  %s1671_s14 = smov (!%p356_p3, %s1007_s14), 1  ;;  %v1263_v3 = vld [vmem:[%s1660_s1] sm:$0xff]  ;;  %v1187_v26 = vmov 0.0  }
   0xc   : > { %756 = vmatpush.bf16.msra.mxu0 %v1061_v0  ;;  %1104 = vmatpush.bf16.msra.mxu1 %v1061_v0  ;;  %v1266_v5 = vperm.slane %v1263_v3, 1  ;;  %s1052_s21 = sshll.u32 %s1671_s14, 5  ;;  %v403_v7 = vperm.slane %v1263_v3, 0  ;;  %v413_v8 = vperm.slane %v1263_v3, 3  ;;  %v1059_v10 = vld [vmem:[%s1664_s5 + $0x28] sm:$0xff]  ;;  %v431_v11 = vperm.slane %v1263_v3, 6  ;;  %s368_s20 = scalar_lea.vmem %s1669_s10, %s1671_s14 }
   0xd   : > { %v388_v4 = vshrl.u32 %v387_v1, 7  ;;  %1105 = vmatpush.bf16.msra.mxu2 %v1061_v0  ;;  %1106 = vmatpush.bf16.msra.mxu3 %v1061_v0  ;;  %s360_s26 = scalar_lea.vmem %s1659_s0, %s1052_s21  ;;  %v1284_v13 = vperm.slane %v1263_v3, 4  ;;  %v1287_v14 = vperm.slane %v1263_v3, 7  ;;  %v514_v18 = vperm.slane %v1263_v3, 2  ;;  %v1058_v33 = vld [vmem:[%s1664_s5 + $0x20] sm:$0xff]  ;;  %v1057_v51 = vld [vmem:[%s1664_s5 + $0x18] sm:$0xff]  ;;  %s1630_s18 = scalar_lea.vmem %s1668_s9, %s1052_s21 }
   0xe   : > { %v1281_v12 = vmul.f32 0.0, %v1266_v5  ;;  %v1063_v15 = vld [vmem:[%s360_s26] sm:$0xff]   ;;  %v1098_v16 = vld [vmem:[%s360_s26 + $0x8] sm:$0xff]   ;;  %v1289_v17 = vld [vmem:[%s360_s26 + $0x10] sm:$0xff]   ;;  %v532_v23 = vperm.slane %v1263_v3, 5 }
   0xf   : > { %v397_v6 = vadd.s32 4294967295, %v388_v4  ;;  %v508_v9 = vadd.s32 1, %v388_v4  ;;  %v1292_v19 = vunpack.c.l.bf16 %v1063_v15  ;;  %v1294_v20 = vunpack.c.h.bf16 %v1063_v15  ;;  %v1298_v22 = vld [vmem:[%s360_s26 + $0x18] sm:$0xff]   ;;  %v1138_v42 = vld [vmem:[%s1660_s1 + $0x8] ss:$0 sm:$0xff]  ;;  %v1056_v4 = vld [vmem:[%s1664_s5 + $0x10] sm:$0xff] }
  0x10   : > { %757 = vmatpush.bf16.msra.mxu0 %v1060_v2  ;;  %1107 = vmatpush.bf16.msra.mxu1 %v1060_v2  ;;  %v1296_v21 = vunpack.c.l.bf16 %v1098_v16  ;;  %v1302_v24 = vunpack.c.l.bf16 %v1289_v17  ;;  %v1305_v25 = vunpack.c.l.bf16 %v1298_v22  ;;  %v1311_v32 = vunpack.c.h.bf16 %v1098_v16 }
  0x11   : > { %vm398_vm0 = vcmp.ge.s32.totalorder %v397_v6, 0  ;;  %vm510_vm1 = vcmp.lt.s32.totalorder %v508_v9, 8  ;;  %1108 = vmatpush.bf16.msra.mxu2 %v1060_v2  ;;  %1109 = vmatpush.bf16.msra.mxu3 %v1060_v2  ;;  %v389_v29 = vrot.slane %v1292_v19, 7  ;;  %v390_v30 = vrot.slane %v1294_v20, 7 }
  0x12   : > { %v1016_v27 = vsel %vm398_vm0, 1.0, %v1187_v26  ;;  %v1017_v28 = vsel %vm510_vm1, 1.0, %v1187_v26  ;;  %v391_v34 = vrot.slane %v1296_v21, 7  ;;  %v451_v37 = vmul.f32 %v1292_v19, %v1266_v5 }
  0x13   : > { %v1309_v31 = vmul.f32 %v1016_v27, %v403_v7  ;;  %v1317_v35 = vmul.f32 %v1016_v27, %v413_v8  ;;  %v1319_v36 = vmul.f32 %v1016_v27, %v431_v11  ;;  %v467_v40 = vmul.f32 %v1292_v19, %v1284_v13 }
  0x14   : > { %758 = vmatpush.bf16.msra.mxu0 %v1059_v10  ;;  %1110 = vmatpush.bf16.msra.mxu1 %v1059_v10  ;;  %v500_v41 = vrot.slane %v1292_v19, 1  ;;  %v468_v47 = vmul.f32 %v1294_v20, %v1284_v13  ;;  %v484_v48 = vmul.f32 %v1294_v20, %v1287_v14  ;;  %v485_v49 = vmul.f32 %v1296_v21, %v1287_v14 }
  0x15   : > { %1111 = vmatpush.bf16.msra.mxu2 %v1059_v10  ;;  %1112 = vmatpush.bf16.msra.mxu3 %v1059_v10  ;;  %v405_v38 = vmul.f32 0.0, %v1309_v31  ;;  %v406_v39 = vmul.f32 %v1309_v31, %v389_v29  ;;  %v415_v43 = vmul.f32 %v1317_v35, %v389_v29  ;;  %v416_v44 = vmul.f32 %v1317_v35, %v390_v30 }
  0x16   : > { %v433_v45 = vmul.f32 %v1319_v36, %v390_v30  ;;  %v434_v46 = vmul.f32 %v1319_v36, %v391_v34  ;;  %v501_v50 = vrot.slane %v1294_v20, 1  ;;  %v502_v54 = vrot.slane %v1296_v21, 1 }
  0x17   : > { %v423_v52 = vadd.f32 %v415_v43, %v405_v38  ;;  %v424_v53 = vadd.f32 %v416_v44, %v406_v39  ;;  %v1346_v55 = vmul.f32 %v1017_v28, %v514_v18  ;;  %v1348_v56 = vmul.f32 %v1017_v28, %v532_v23 }
  0x18   : > { %759 = vmatpush.bf16.msra.mxu0 %v1058_v33  ;;  %1113 = vmatpush.bf16.msra.mxu1 %v1058_v33  ;;  %v1350_v57 = vmul.f32 %v1138_v42, %v1017_v28  ;;  %v1353_v58 = vrot.slane %v1311_v32, 7  ;;  %v1356_v59 = vrot.slane %v1302_v24, 7  ;;  %v407_v63 = vmul.f32 %v1309_v31, %v390_v30 }
  0x19   : > { %1114 = vmatpush.bf16.msra.mxu2 %v1058_v33  ;;  %1115 = vmatpush.bf16.msra.mxu3 %v1058_v33  ;;  %v441_v60 = vadd.f32 %v433_v45, %v423_v52  ;;  %v442_v61 = vadd.f32 %v434_v46, %v424_v53  ;;  %v517_v62 = vmul.f32 %v1346_v55, %v500_v41  ;;  %v516_v8 = vmul.f32 0.0, %v1346_v55  ;;  %v1055_v33 = vld [vmem:[%s1664_s5 + $0x8] sm:$0xff]  ;;  %v1054_v52 = vld [vmem:[%s1664_s5] sm:$0xff] }
  0x1a   : > { %v534_v0 = vmul.f32 %v1348_v56, %v500_v41  ;;  %v535_v1 = vmul.f32 %v1348_v56, %v501_v50  ;;  %v552_v2 = vmul.f32 %v1350_v57, %v501_v50  ;;  %v553_v3 = vmul.f32 %v1350_v57, %v502_v54 }
  0x1b   : > { %v458_v6 = vadd.f32 %v1281_v12, %v441_v60  ;;  %v459_v7 = vadd.f32 %v451_v37, %v442_v61  ;;  %v408_v9 = vmul.f32 %v1309_v31, %v391_v34  ;;  %v417_v10 = vmul.f32 %v1317_v35, %v391_v34  ;;  %v1410_v61 = vld [vmem:[%s1661_s2] ss:$0 sm:$0xff] }
  0x1c   : > { %760 = vmatpush.bf16.msra.mxu0 %v1057_v51  ;;  %1116 = vmatpush.bf16.msra.mxu1 %v1057_v51  ;;  %v418_v11 = vmul.f32 %v1317_v35, %v1353_v58  ;;  %v435_v15 = vmul.f32 %v1319_v36, %v1353_v58  ;;  %v1376_v16 = vrot.slane %v1311_v32, 1  ;;  %v436_v23 = vmul.f32 %v1319_v36, %v1356_v59 }
  0x1d   : > { %1117 = vmatpush.bf16.msra.mxu2 %v1057_v51  ;;  %1118 = vmatpush.bf16.msra.mxu3 %v1057_v51  ;;  %v475_v18 = vadd.f32 %v467_v40, %v458_v6  ;;  %v476_v12 = vadd.f32 %v468_v47, %v459_v7  ;;  %v452_v26 = vmul.f32 %v1294_v20, %v1266_v5  ;;  %v1392_v39 = vunpack.c.h.bf16 %v1289_v17 }
  0x1e   : > { %v425_v27 = vadd.f32 %v417_v10, %v407_v63  ;;  %v426_v28 = vadd.f32 %v418_v11, %v408_v9  ;;  %v453_v29 = vmul.f32 %v1296_v21, %v1266_v5  ;;  %v469_v30 = vmul.f32 %v1296_v21, %v1284_v13 }
  0x1f   : > { %v492_v34 = vadd.f32 %v484_v48, %v475_v18  ;;  %v493_v37 = vadd.f32 %v485_v49, %v476_v12  ;;  %v470_v38 = vmul.f32 %v1311_v32, %v1284_v13  ;;  %v486_v42 = vmul.f32 %v1311_v32, %v1287_v14 }
  0x20   : > { %761 = vmatpush.bf16.msra.mxu0 %v1056_v4  ;;  %1119 = vmatpush.bf16.msra.mxu1 %v1056_v4  ;;  %v443_v40 = vadd.f32 %v435_v15, %v425_v27  ;;  %v444_v41 = vadd.f32 %v436_v23, %v426_v28  ;;  %v1397_v43 = vrot.slane %v1302_v24, 1  ;;  %v487_v46 = vmul.f32 %v1302_v24, %v1287_v14 }
  0x21   : > { %1120 = vmatpush.bf16.msra.mxu2 %v1056_v4  ;;  %1121 = vmatpush.bf16.msra.mxu3 %v1056_v4  ;;  %v524_v44 = vadd.f32 %v516_v8, %v492_v34  ;;  %v525_v45 = vadd.f32 %v517_v62, %v493_v37  ;;  %v518_v47 = vmul.f32 %v1346_v55, %v501_v50  ;;  %v1415_v62 = vrot.slane %v1392_v39, 7 }
  0x22   : > { %v460_v48 = vadd.f32 %v452_v26, %v443_v40  ;;  %v461_v17 = vadd.f32 %v453_v29, %v444_v41  ;;  %v519_v49 = vmul.f32 %v1346_v55, %v502_v54  ;;  %v536_v51 = vmul.f32 %v1348_v56, %v502_v54 }
  0x23   : > { %v542_v53 = vadd.f32 %v534_v0, %v524_v44  ;;  %v543_v60 = vadd.f32 %v535_v1, %v525_v45  ;;  %v537_v50 = vmul.f32 %v1348_v56, %v1376_v16  ;;  %v554_v4 = vmul.f32 %v1350_v57, %v1376_v16 }
  0x24   : > { %762 = vmatpush.bf16.msra.mxu0 %v1055_v33  ;;  %1122 = vmatpush.bf16.msra.mxu1 %v1055_v33  ;;  %v477_v54 = vadd.f32 %v469_v30, %v460_v48  ;;  %v478_v63 = vadd.f32 %v470_v38, %v461_v17  ;;  %v555_v6 = vmul.f32 %v1350_v57, %v1397_v43  ;;  %v1435_v26 = vrot.slane %v1392_v39, 1 }
  0x25   : > { %1123 = vmatpush.bf16.msra.mxu2 %v1055_v33  ;;  %1124 = vmatpush.bf16.msra.mxu3 %v1055_v33  ;;  %v560_v0 = vadd.f32 %v552_v2, %v542_v53  ;;  %v561_v1 = vadd.f32 %v553_v3, %v543_v60  ;;  %v409_v7 = vmul.f32 %v1309_v31, %v1353_v58  ;;  %v1430_v3 = vrot.slane %v1305_v25, 7 }
  0x26   : > { %v494_v8 = vadd.f32 %v486_v42, %v477_v54  ;;  %v495_v9 = vadd.f32 %v487_v46, %v478_v63  ;;  %v410_v10 = vmul.f32 %v1309_v31, %v1356_v59  ;;  %v419_v11 = vmul.f32 %v1317_v35, %v1356_v59 }
  0x27   : > { %v572_v15 = vadd.f32 %v1410_v61, %v560_v0  ;;  %v573_v2 = vadd.f32 %v1410_v61, %v561_v1  ;;  %v420_v58 = vmul.f32 %v1317_v35, %v1415_v62  ;;  %v1438_v28 = vrot.slane %v1305_v25, 1 }
  0x28   : > { %763 = vmatpush.bf16.msra.mxu0 %v1054_v52  ;;  %1125 = vmatpush.bf16.msra.mxu1 %v1054_v52  ;;  %v526_v18 = vadd.f32 %v518_v47, %v494_v8  ;;  %v527_v12 = vadd.f32 %v519_v49, %v495_v9  ;;  %v427_v23 = vadd.f32 %v419_v11, %v409_v7  ;;  %v1441_v29 = vunpack.c.h.bf16 %v1298_v22 }
  0x29   : > { %1126 = vmatpush.bf16.msra.mxu2 %v1054_v52  ;;  %1127 = vmatpush.bf16.msra.mxu3 %v1054_v52  ;;  %v588_v59 = vmul.f32 0.044715, %v572_v15  ;;  %v589_v27 = vmul.f32 0.044715, %v573_v2  ;;  %v428_v34 = vadd.f32 %v420_v58, %v410_v10  ;;  %v437_v37 = vmul.f32 %v1319_v36, %v1415_v62 }
  0x2a   : > { %v544_v30 = vadd.f32 %v536_v51, %v526_v18  ;;  %v545_v33 = vadd.f32 %v537_v50, %v527_v12  ;;  %v438_v41 = vmul.f32 %v1319_v36, %v1430_v3  ;;  %v454_v42 = vmul.f32 %v1311_v32, %v1266_v5 }
  0x2b   : > { %v596_v38 = vmul.f32 %v588_v59, %v572_v15  ;;  %v597_v40 = vmul.f32 %v589_v27, %v573_v2  ;;  %v445_v46 = vadd.f32 %v437_v37, %v427_v23  ;;  %v455_v22 = vmul.f32 %v1302_v24, %v1266_v5 }
  0x2c   : > { %v562_v44 = vadd.f32 %v554_v4, %v544_v30  ;;  %v563_v45 = vadd.f32 %v555_v6, %v545_v33  ;;  %v446_v17 = vadd.f32 %v438_v41, %v428_v34  ;;  %v471_v49 = vmul.f32 %v1302_v24, %v1284_v13 }
  0x2d   : > { %v604_v47 = vmul.f32 %v596_v38, %v572_v15  ;;  %v605_v48 = vmul.f32 %v597_v40, %v573_v2  ;;  %v462_v53 = vadd.f32 %v454_v42, %v445_v46  ;;  %v472_v60 = vmul.f32 %v1392_v39, %v1284_v13 }
  0x2e   : > { %v1454_v51 = vadd.f32 %v1410_v61, %v562_v44  ;;  %v1457_v52 = vadd.f32 %v1410_v61, %v563_v45  ;;  %v463_v63 = vadd.f32 %v455_v22, %v446_v17  ;;  %v488_v4 = vmul.f32 %v1392_v39, %v1287_v14 }
  0x2f   : > { %v612_v50 = vadd.f32 %v604_v47, %v572_v15  ;;  %v613_v54 = vadd.f32 %v605_v48, %v573_v2  ;;  %v580_v0 = vmul.f32 0.5, %v572_v15  ;;  %v581_v1 = vmul.f32 0.5, %v573_v2 }
  0x30   : > { %v590_v6 = vmul.f32 0.044715, %v1454_v51  ;;  %v591_v7 = vmul.f32 0.044715, %v1457_v52  ;;  %v479_v10 = vadd.f32 %v471_v49, %v462_v53  ;;  %v480_v11 = vadd.f32 %v472_v60, %v463_v63 }
  0x31   : > { %v620_v8 = vmul.f32 0.7978846, %v612_v50  ;;  %v621_v9 = vmul.f32 0.7978846, %v613_v54  ;;  %v489_v12 = vmul.f32 %v1305_v25, %v1287_v14  ;;  %v520_v23 = vmul.f32 %v1346_v55, %v1376_v16 }
  0x32   : > { %v598_v58 = vmul.f32 %v590_v6, %v1454_v51  ;;  %v599_v18 = vmul.f32 %v591_v7, %v1457_v52  ;;  %v496_v15 = vadd.f32 %v488_v4, %v479_v10  ;;  %v521_v2 = vmul.f32 %v1346_v55, %v1397_v43 }
  0x33   : > { %1145 = vtanh.f32 %v620_v8  ;;  %v538_v59 = vmul.f32 %v1348_v56, %v1397_v43  ;;  %v497_v33 = vadd.f32 %v489_v12, %v480_v11  ;;  %v539_v37 = vmul.f32 %v1348_v56, %v1435_v26 }
  0x34   : > { %1147 = vtanh.f32 %v621_v9  ;;  %v606_v27 = vmul.f32 %v598_v58, %v1454_v51  ;;  %v607_v30 = vmul.f32 %v599_v18, %v1457_v52  ;;  %v528_v34 = vadd.f32 %v520_v23, %v496_v15 }
  0x35   : > { %v556_v16 = vmul.f32 %v1350_v57, %v1435_v26  ;;  %v557_v38 = vmul.f32 %v1350_v57, %v1438_v28  ;;  %v529_v41 = vadd.f32 %v521_v2, %v497_v33  ;;  %v396_v42 = vrot.slane %v1441_v29, 7 }
  0x36   : > { %v614_v40 = vadd.f32 %v606_v27, %v1454_v51  ;;  %v615_v43 = vadd.f32 %v607_v30, %v1457_v52  ;;  %v546_v44 = vadd.f32 %v538_v59, %v528_v34  ;;  %v411_v45 = vmul.f32 %v1309_v31, %v1415_v62 }
  0x37   : > { %v412_v46 = vmul.f32 %v1309_v31, %v1430_v3  ;;  %v421_v22 = vmul.f32 %v1317_v35, %v1430_v3  ;;  %v547_v17 = vadd.f32 %v539_v37, %v529_v41  ;;  %v422_v49 = vmul.f32 %v1317_v35, %v396_v42  ;;  %v1498_v31 = vld [vmem:[%s1662_s3] ss:$0 sm:$0xff] }
  0x38   : > { %v622_v47 = vmul.f32 0.7978846, %v614_v40  ;;  %v623_v48 = vmul.f32 0.7978846, %v615_v43  ;;  %v564_v60 = vadd.f32 %v556_v16, %v546_v44  ;;  %v439_v54 = vmul.f32 %v1319_v36, %v396_v42 }
  0x39   : > { %v1146_v53 = vpop.eup %1145  ;;  %v429_v50 = vadd.f32 %v421_v22, %v411_v45  ;;  %v440_v63 = vmul.f32 0.0, %v1319_v36  ;;  %v565_v3 = vadd.f32 %v557_v38, %v547_v17  ;;  %v430_v6 = vadd.f32 %v422_v49, %v412_v46  ;;  %v1506_v36 = vld [vmem:[%s1663_s4] ss:$0 sm:$0xff] }
  0x3a   : > { %v1148_v4 = vpop.eup %1147  ;;  %v636_v62 = vadd.f32 1.0, %v1146_v53  ;;  %1149 = vtanh.f32 %v622_v47  ;;  %v1501_v35 = vadd.f32 %v1410_v61, %v564_v60  ;;  %v456_v58 = vmul.f32 %v1392_v39, %v1266_v5 }
  0x3b   : > { %v637_v7 = vadd.f32 1.0, %v1148_v4  ;;  %1151 = vtanh.f32 %v623_v48  ;;  %v447_v8 = vadd.f32 %v439_v54, %v429_v50  ;;  %v1509_v10 = vadd.f32 %v1410_v61, %v565_v3 }
  0x3c   : > { %v644_v9 = vmul.f32 %v636_v62, %v580_v0  ;;  %v448_v11 = vadd.f32 %v440_v63, %v430_v6  ;;  %v582_v12 = vmul.f32 0.5, %v1454_v51  ;;  %v592_v23 = vmul.f32 0.044715, %v1501_v35 }
  0x3d   : > { %v645_v18 = vmul.f32 %v637_v7, %v581_v1  ;;  %v457_v0 = vmul.f32 %v1305_v25, %v1266_v5  ;;  %v583_v2 = vmul.f32 0.5, %v1457_v52  ;;  %v593_v59 = vmul.f32 0.044715, %v1509_v10 }
  0x3e   : > { %v656_v15 = vmul.f32 %v1498_v31, %v644_v9  ;;  %v464_v27 = vadd.f32 %v456_v58, %v447_v8  ;;  %v600_v33 = vmul.f32 %v592_v23, %v1501_v35  ;;  %v473_v51 = vmul.f32 %v1305_v25, %v1284_v13 }
  0x3f   : > { %v657_v30 = vmul.f32 %v1498_v31, %v645_v18  ;;  %v465_v34 = vadd.f32 %v457_v0, %v448_v11  ;;  %v601_v5 = vmul.f32 %v593_v59, %v1509_v10  ;;  %v474_v16 = vmul.f32 %v1441_v29, %v1284_v13 }
  0x40   : > { %v1150_v1 = vpop.eup %1149  ;;  %v668_v37 = vadd.f32 %v1506_v36, %v656_v15  ;;  %v490_v52 = vmul.f32 %v1441_v29, %v1287_v14  ;;  %v608_v41 = vmul.f32 %v600_v33, %v1501_v35  ;;  %v481_v42 = vadd.f32 %v473_v51, %v464_v27 }
  0x41   : > { %v1152_v38 = vpop.eup %1151  ;;  %v669_v40 = vadd.f32 %v1506_v36, %v657_v30  ;;  %v638_v43 = vadd.f32 1.0, %v1150_v1  ;;  %v609_v46 = vmul.f32 %v601_v5, %v1509_v10  ;;  %v482_v22 = vadd.f32 %v474_v16, %v465_v34 }
  0x42   : > { %v1533_v44 = vadd.f32 %v1292_v19, %v668_v37  ;;  %v639_v45 = vadd.f32 1.0, %v1152_v38  ;;  %v616_v48 = vadd.f32 %v608_v41, %v1501_v35  ;;  %v491_v17 = vmul.f32 0.0, %v1287_v14 }
  0x43   : > { %v1537_v47 = vadd.f32 %v1294_v20, %v669_v40  ;;  %v646_v13 = vmul.f32 %v638_v43, %v582_v12  ;;  %v617_v53 = vadd.f32 %v609_v46, %v1509_v10  ;;  %v498_v60 = vadd.f32 %v490_v52, %v481_v42 }
  0x44   : > { %v647_v49 = vmul.f32 %v639_v45, %v583_v2  ;;  %v507_v50 = vrot.slane %v1441_v29, 1  ;;  %v624_v63 = vmul.f32 0.7978846, %v616_v48  ;;  %v499_v4 = vadd.f32 %v491_v17, %v482_v22 }
  0x45   : > { %v684_v19 = vpack.c.bf16 %v1537_v47, %v1533_v44  ;;  %v658_v54 = vmul.f32 %v1498_v31, %v646_v13  ;;  %v625_v62 = vmul.f32 0.7978846, %v617_v53  ;;  %v522_v3 = vmul.f32 %v1346_v55, %v1435_v26 }
  0x46   : > { %v659_v20 = vmul.f32 %v1498_v31, %v647_v49  ;;  %v523_v14 = vmul.f32 %v1346_v55, %v1438_v28  ;;  %1153 = vtanh.f32 %v624_v63  ;;  %v540_v7 = vmul.f32 %v1348_v56, %v1438_v28 }
  0x47   : > { %764 = vmatmul.bf16.vlgmr.msra.gmra.mxu0 %v684_v19  ;;  %v670_v6 = vadd.f32 %v1506_v36, %v658_v54  ;;  %v541_v8 = vmul.f32 %v1348_v56, %v507_v50  ;;  %1155 = vtanh.f32 %v625_v62  ;;  %v530_v11 = vadd.f32 %v522_v3, %v498_v60 }
  0x48   : > { %v671_v9 = vadd.f32 %v1506_v36, %v659_v20  ;;  %v531_v58 = vadd.f32 %v523_v14, %v499_v4  ;;  %v558_v26 = vmul.f32 %v1350_v57, %v507_v50  ;;  %v559_v55 = vmul.f32 0.0, %v1350_v57  ;;  %v1597_v14 = vld [vmem:[%s1665_s6] ss:$0 sm:$0xff] }
  0x49   : > { %v1557_v18 = vadd.f32 %v1296_v21, %v670_v6  ;;  %v548_v23 = vadd.f32 %v540_v7, %v530_v11  ;;  %v584_v28 = vmul.f32 0.5, %v1501_v35  ;;  %v585_v21 = vmul.f32 0.5, %v1509_v10 }
  0x4a   : > { %v1562_v12 = vadd.f32 %v1311_v32, %v671_v9  ;;  %v549_v0 = vadd.f32 %v541_v8, %v531_v58 }
  0x4b   : > { %v566_v15 = vadd.f32 %v558_v26, %v548_v23 }
  0x4c   : > { %v685_v56 = vpack.c.bf16 %v1562_v12, %v1557_v18  ;;  %v567_v2 = vadd.f32 %v559_v55, %v549_v0  ;;  %v1154_v59 = vpop.eup %1153 }
  0x4d   : > { %v1156_v27 = vpop.eup %1155  ;;  %v640_v30 = vadd.f32 1.0, %v1154_v59  ;;  %v578_v57 = vadd.f32 %v1410_v61, %v566_v15 }
  0x4e   : > { %769 = vmatmul.bf16.vlgmr.msra.gmra.mxu1 %v685_v56  ;;  %v579_v32 = vadd.f32 %v1410_v61, %v567_v2  ;;  %v641_v33 = vadd.f32 1.0, %v1156_v27 }
  0x4f   : > { %v648_v34 = vmul.f32 %v640_v30, %v584_v28  ;;  %v594_v51 = vmul.f32 0.044715, %v578_v57  ;;  %v586_v48 = vmul.f32 0.5, %v578_v57 }
  0x50   : > { %v649_v1 = vmul.f32 %v641_v33, %v585_v21  ;;  %v595_v37 = vmul.f32 0.044715, %v579_v32  ;;  %v587_v49 = vmul.f32 0.5, %v579_v32 }
  0x51   : > { %v660_v5 = vmul.f32 %v1498_v31, %v648_v34  ;;  %v602_v35 = vmul.f32 %v594_v51, %v578_v57 }
  0x52   : > { %v661_v16 = vmul.f32 %v1498_v31, %v649_v1  ;;  %v603_v52 = vmul.f32 %v595_v37, %v579_v32 }
  0x53   : > { %v672_v10 = vadd.f32 %v1506_v36, %v660_v5  ;;  %v610_v38 = vmul.f32 %v602_v35, %v578_v57 }
  0x54   : > { %v673_v40 = vadd.f32 %v1506_v36, %v661_v16  ;;  %v611_v43 = vmul.f32 %v603_v52, %v579_v32 }
  0x55   : > { %v1575_v41 = vadd.f32 %v1302_v24, %v672_v10  ;;  %v618_v61 = vadd.f32 %v610_v38, %v578_v57 }
  0x56   : > { %v1578_v42 = vadd.f32 %v1392_v39, %v673_v40  ;;  %v619_v45 = vadd.f32 %v611_v43, %v579_v32 }
  0x57   : > { %v626_v46 = vmul.f32 0.7978846, %v618_v61 }
  0x58   : > { %v686_v22 = vpack.c.bf16 %v1578_v42, %v1575_v41  ;;  %v627_v13 = vmul.f32 0.7978846, %v619_v45  ;;  %v1607_v45 = vld [vmem:[%s1666_s7] ss:$0 sm:$0xff] }
  0x59   : > { %1157 = vtanh.f32 %v626_v46 }
  0x5a   : > { %774 = vmatmul.bf16.vlgmr.msra.gmra.mxu2 %v686_v22  ;;  %1159 = vtanh.f32 %v627_v13 }
  0x5f   : > { %v1158_v17 = vpop.eup %1157 }
  0x60   : > { %v1160_v53 = vpop.eup %1159  ;;  %v642_v60 = vadd.f32 1.0, %v1158_v17 }
  0x61   : > { %v643_v24 = vadd.f32 1.0, %v1160_v53 }
  0x62   : > { %v650_v50 = vmul.f32 %v642_v60, %v586_v48 }
  0x63   : > { %v651_v19 = vmul.f32 %v643_v24, %v587_v49  ;;  %v1613_v24 = vld [vmem:[%s1667_s8] ss:$0 sm:$0xff] }
  0x64   : > { %v662_v39 = vmul.f32 %v1498_v31, %v650_v50 }
  0x65   : > { %v663_v54 = vmul.f32 %v1498_v31, %v651_v19 }
  0x66   : > { %v674_v63 = vadd.f32 %v1506_v36, %v662_v39 }
  0x67   : > { %v675_v4 = vadd.f32 %v1506_v36, %v663_v54 }
  0x68   : > { %v1587_v20 = vadd.f32 %v1305_v25, %v674_v63 }
  0x69   : > { %v1590_v62 = vadd.f32 %v1441_v29, %v675_v4 }
  0x6b   : > { %v687_v3 = vpack.c.bf16 %v1590_v62, %v1587_v20 }
  0x6d   : > { %779 = vmatmul.bf16.vlgmr.msra.gmra.mxu3 %v687_v3 }
  0xc4   : > { %v765_v31 = vpop.f32.mrf.mxu0 }
  0xc5   : > { %v766_v6 = vadd.f32 %v1597_v14, %v765_v31 }
  0xc7   : > { %v793_v7 = vmul.f32 0.044715, %v766_v6  ;;  %v785_v38 = vmul.f32 0.5, %v766_v6 }
  0xc9   : > { %v801_v36 = vmul.f32 %v793_v7, %v766_v6 }
  0xcb   : > { %v809_v8 = vmul.f32 %v801_v36, %v766_v6  ;;  %v770_v25 = vpop.f32.mrf.mxu1 }
  0xcc   : > { %v771_v9 = vadd.f32 %v1597_v14, %v770_v25  ;;  %v767_v23 = vpop.f32.mrf.mxu0 }
  0xcd   : > { %v817_v29 = vadd.f32 %v809_v8, %v766_v6  ;;  %v768_v28 = vadd.f32 %v1597_v14, %v767_v23 }
  0xce   : > { %v795_v11 = vmul.f32 0.044715, %v771_v9  ;;  %v787_v43 = vmul.f32 0.5, %v771_v9 }
  0xcf   : > { %v825_v26 = vmul.f32 0.7978846, %v817_v29  ;;  %v794_v59 = vmul.f32 0.044715, %v768_v28  ;;  %v786_v17 = vmul.f32 0.5, %v768_v28 }
  0xd0   : > { %v803_v58 = vmul.f32 %v795_v11, %v771_v9 }
  0xd1   : > { %1161 = vtanh.f32 %v825_v26  ;;  %v802_v27 = vmul.f32 %v794_v59, %v768_v28 }
  0xd2   : > { %v811_v55 = vmul.f32 %v803_v58, %v771_v9 }
  0xd3   : > { %v772_v0 = vpop.f32.mrf.mxu1  ;;  %v810_v57 = vmul.f32 %v802_v27, %v768_v28 }
  0xd4   : > { %v819_v56 = vadd.f32 %v811_v55, %v771_v9  ;;  %v773_v15 = vadd.f32 %v1597_v14, %v772_v0 }
  0xd5   : > { %v818_v34 = vadd.f32 %v810_v57, %v768_v28 }
  0xd6   : > { %v827_v2 = vmul.f32 0.7978846, %v819_v56  ;;  %v796_v21 = vmul.f32 0.044715, %v773_v15  ;;  %v788_v63 = vmul.f32 0.5, %v773_v15 }
  0xd7   : > { %v1162_v33 = vpop.eup %1161  ;;  %v826_v5 = vmul.f32 0.7978846, %v818_v34 }
  0xd8   : > { %1163 = vtanh.f32 %v827_v2  ;;  %v804_v30 = vmul.f32 %v796_v21, %v773_v15  ;;  %v841_v35 = vadd.f32 1.0, %v1162_v33 }
  0xd9   : > { %1165 = vtanh.f32 %v826_v5 }
  0xda   : > { %v812_v32 = vmul.f32 %v804_v30, %v773_v15  ;;  %v849_v61 = vmul.f32 %v841_v35, %v785_v38 }
  0xdc   : > { %v820_v51 = vadd.f32 %v812_v32, %v773_v15  ;;  %v861_v60 = vmul.f32 %v1607_v45, %v849_v61 }
  0xdd   : > { %v775_v37 = vpop.f32.mrf.mxu2 }
  0xde   : > { %v1164_v1 = vpop.eup %1163  ;;  %v776_v16 = vadd.f32 %v1597_v14, %v775_v37  ;;  %v828_v52 = vmul.f32 0.7978846, %v820_v51  ;;  %v873_v36 = vadd.f32 %v1613_v24, %v861_v60 }
  0xdf   : > { %v843_v10 = vadd.f32 1.0, %v1164_v1  ;;  %v1166_v48 = vpop.eup %1165 }
  0xe0   : > { %v797_v40 = vmul.f32 0.044715, %v776_v16  ;;  %1167 = vtanh.f32 %v828_v52  ;;  %v842_v19 = vadd.f32 1.0, %v1166_v48  ;;  %v881_v55 = vadd.f32 %v873_v36, %v1533_v44 }
  0xe1   : > { %v851_v22 = vmul.f32 %v843_v10, %v787_v43  ;;  %v789_v30 = vmul.f32 0.5, %v776_v16 }
  0xe2   : > { %v805_v46 = vmul.f32 %v797_v40, %v776_v16  ;;  %v850_v31 = vmul.f32 %v842_v19, %v786_v17 }
  0xe3   : > { %v863_v54 = vmul.f32 %v1607_v45, %v851_v22 }
  0xe4   : > { %v813_v13 = vmul.f32 %v805_v46, %v776_v16  ;;  %v862_v8 = vmul.f32 %v1607_v45, %v850_v31 }
  0xe5   : > { %v777_v49 = vpop.f32.mrf.mxu2  ;;  %v875_v9 = vadd.f32 %v1613_v24, %v863_v54 }
  0xe6   : > { %v1168_v53 = vpop.eup %1167  ;;  %v821_v50 = vadd.f32 %v813_v13, %v776_v16  ;;  %v778_v39 = vadd.f32 %v1597_v14, %v777_v49  ;;  %v874_v11 = vadd.f32 %v1613_v24, %v862_v8 }
  0xe7   : > { %v844_v4 = vadd.f32 1.0, %v1168_v53  ;;  %v883_v56 = vadd.f32 %v875_v9, %v1557_v18 }
  0xe8   : > { %v829_v3 = vmul.f32 0.7978846, %v821_v50  ;;  %v798_v6 = vmul.f32 0.044715, %v778_v39  ;;  %v882_v23 = vadd.f32 %v874_v11, %v1537_v47  ;;  %v790_v18 = vmul.f32 0.5, %v778_v39 }
  0xe9   : > { %v852_v7 = vmul.f32 %v844_v4, %v788_v63  ;;  %v1188_v4 = vmov 64.0  }
  0xea   : > { %1169 = vtanh.f32 %v829_v3  ;;  %v806_v25 = vmul.f32 %v798_v6, %v778_v39  ;;  %v1081_v59 = vpack.c.bf16 %v882_v23, %v881_v55  ;;  %v905_v61 = vadd.f32 %v882_v23, %v881_v55 }
  0xeb   : > { %v864_v29 = vmul.f32 %v1607_v45, %v852_v7 }
  0xec   : > { %v814_v58 = vmul.f32 %v806_v25, %v778_v39  ;;  %1082 = vst [vmem:[%s1630_s18] sm:$0xff] %v1081_v59   ;;  %v906_v49 = vadd.f32 %v905_v61, %v883_v56 }
  0xed   : > { %v876_v26 = vadd.f32 %v1613_v24, %v864_v29 }
  0xee   : > { %v822_v0 = vadd.f32 %v814_v58, %v778_v39 }
  0xef   : > { %v884_v28 = vadd.f32 %v876_v26, %v1562_v12 }
  0xf0   : > { %v1170_v15 = vpop.eup %1169  ;;  %v780_v2 = vpop.f32.mrf.mxu3  ;;  %v830_v21 = vmul.f32 0.7978846, %v822_v0 }
  0xf1   : > { %v845_v44 = vadd.f32 1.0, %v1170_v15  ;;  %v781_v47 = vadd.f32 %v1597_v14, %v780_v2  ;;  %v1086_v27 = vpack.c.bf16 %v884_v28, %v883_v56  ;;  %v907_v54 = vadd.f32 %v906_v49, %v884_v28 }
  0xf2   : > { %1171 = vtanh.f32 %v830_v21 }
  0xf3   : > { %v799_v57 = vmul.f32 0.044715, %v781_v47  ;;  %1101 = vst [vmem:[%s1630_s18 + $0x8] sm:$0xff] %v1086_v27   ;;  %v853_v32 = vmul.f32 %v845_v44, %v789_v30  ;;  %v791_v60 = vmul.f32 0.5, %v781_v47 }
  0xf5   : > { %v807_v33 = vmul.f32 %v799_v57, %v781_v47  ;;  %v865_v12 = vmul.f32 %v1607_v45, %v853_v32 }
  0xf7   : > { %v815_v34 = vmul.f32 %v807_v33, %v781_v47  ;;  %v877_v40 = vadd.f32 %v1613_v24, %v865_v12 }
  0xf8   : > { %v1172_v51 = vpop.eup %1171  ;;  %v782_v1 = vpop.f32.mrf.mxu3 }
  0xf9   : > { %v823_v37 = vadd.f32 %v815_v34, %v781_v47  ;;  %v846_v5 = vadd.f32 1.0, %v1172_v51  ;;  %v783_v35 = vadd.f32 %v1597_v14, %v782_v1  ;;  %v885_v13 = vadd.f32 %v877_v40, %v1575_v41 }
  0xfb   : > { %v831_v52 = vmul.f32 0.7978846, %v823_v37  ;;  %v854_v10 = vmul.f32 %v846_v5, %v790_v18  ;;  %v800_v38 = vmul.f32 0.044715, %v783_v35  ;;  %v908_v3 = vadd.f32 %v907_v54, %v885_v13 }
  0xfd   : > { %1173 = vtanh.f32 %v831_v52  ;;  %v866_v16 = vmul.f32 %v1607_v45, %v854_v10  ;;  %v808_v43 = vmul.f32 %v800_v38, %v783_v35 }
  0xff   : > { %v878_v46 = vadd.f32 %v1613_v24, %v866_v16  ;;  %v816_v22 = vmul.f32 %v808_v43, %v783_v35 }
 0x101   : > { %v886_v48 = vadd.f32 %v878_v46, %v1578_v42  ;;  %v824_v17 = vadd.f32 %v816_v22, %v783_v35  ;;  %v792_v42 = vmul.f32 0.5, %v783_v35 }
 0x103   : > { %v1174_v14 = vpop.eup %1173  ;;  %v1091_v53 = vpack.c.bf16 %v886_v48, %v885_v13  ;;  %v832_v19 = vmul.f32 0.7978846, %v824_v17  ;;  %v909_v36 = vadd.f32 %v908_v3, %v886_v48 }
 0x104   : > { %v847_v50 = vadd.f32 1.0, %v1174_v14 }
 0x105   : > { %1102 = vst [vmem:[%s1630_s18 + $0x10] sm:$0xff] %v1091_v53   ;;  %1175 = vtanh.f32 %v832_v19 }
 0x106   : > { %v855_v39 = vmul.f32 %v847_v50, %v791_v60  ;;  %1177 = vrcp.f32 %v1188_v4 }
 0x108   : > { %v867_v63 = vmul.f32 %v1607_v45, %v855_v39 }
 0x10a   : > { %v879_v41 = vadd.f32 %v1613_v24, %v867_v63 }
 0x10b   : > { %v1176_v31 = vpop.eup %1175 }
 0x10c   : > { %v848_v6 = vadd.f32 1.0, %v1176_v31  ;;  %v1178_v7 = vpop.eup %1177  ;;  %v887_v25 = vadd.f32 %v879_v41, %v1587_v20 }
 0x10d   : > { %v919_v29 = vmul.f32 64.0, %v1178_v7  ;;  %vm923_vm2 = vweird.f32 %v1178_v7 }
 0x10e   : > { %v856_v8 = vmul.f32 %v848_v6, %v792_v42  ;;  %v910_v58 = vadd.f32 %v909_v36, %v887_v25 }
 0x10f   : > { %v920_v55 = vsub.f32 1.0, %v919_v29 }
 0x110   : > { %v868_v9 = vmul.f32 %v1607_v45, %v856_v8 }
 0x111   : > { %v921_v28 = vmul.f32 %v1178_v7, %v920_v55 }
 0x112   : > { %v880_v11 = vadd.f32 %v1613_v24, %v868_v9 }
 0x113   : > { %v922_v59 = vadd.f32 %v1178_v7, %v921_v28 }
 0x114   : > { %v888_v26 = vadd.f32 %v880_v11, %v1590_v62 }
 0x115   : > { %v924_v45 = vsel %vm923_vm2, %v1178_v7, %v922_v59 }
 0x116   : > { %v1096_v23 = vpack.c.bf16 %v888_v26, %v887_v25  ;;  %v911_v0 = vadd.f32 %v910_v58, %v888_v26 }
 0x118   : > { %1103 = vst [vmem:[%s1630_s18 + $0x18] sm:$0xff] %v1096_v23   ;;  %v912_v56 = vrot.slane %v911_v0, 4 }
 0x11a   : > { %v913_v15 = vadd.f32 %v912_v56, %v911_v0 }
 0x11c   : > { %v914_v2 = vrot.slane %v913_v15, 2 }
 0x11e   : > { %v915_v21 = vadd.f32 %v914_v2, %v913_v15 }
 0x120   : > { %v916_v20 = vrot.slane %v915_v21, 1 }
 0x122   : > { %v917_v44 = vadd.f32 %v916_v20, %v915_v21 }
 0x124   : > { %v925_v24 = vmul.f32 %v924_v45, %v917_v44 }
 0x126   : > { %926 = vst [vmem:[%s368_s20] sm:$0x1] %v925_v24 }
 0x127 PF: > { %s21_s13 = sadd.s32 1, %s1185_s13  }
 0x128   : > { %p18_p4 = scmp.ge.s32.totalorder %s21_s13, 4  }
 0x12a   :  { %20 = sbr.rel (!%p18_p4) target bundleno = 1 (0x1), region = 98 }

// kernel: convmixer_forward.7
= control target key start
LH: loop header
LB: loop body
LE: loop exit
PB: predicated region body
PF: predicated region fallthrough
CT: control target
= control target key end

     0   :  { %s238_s0 = inlined_call_operand.vmem [shape: f32[2,128], index: 0, kind: input, shape index: {}]   ;;  %s239_s1 = inlined_call_operand.vmem [shape: bf16[128,10], index: 1, kind: input, shape index: {}]   ;;  %s240_s2 = inlined_call_operand.vmem [shape: f32[1,10], index: 2, kind: input, shape index: {}]   ;;  %s241_s3 = inlined_call_operand.hbm [shape: f32[2,10], index: 3, kind: output, shape index: {}]  }
   0x1   :  { %v155_v0 = vld [vmem:[%s239_s1 + $0x38] sm:$0xff]  ;;  %v154_v1 = vld [vmem:[%s239_s1 + $0x30] sm:$0xff] }
   0x2   :  { %85 = vmatpush.bf16.msra.mxu0 %v155_v0 }
   0x3   :  { %8 = vsyncpa [#allocation3], 0  ;;  %v153_v2 = vld [vmem:[%s239_s1 + $0x28] sm:$0xff]  ;;  %v152_v3 = vld [vmem:[%s239_s1 + $0x20] sm:$0xff]  ;;  %s184_s5 = smov [#allocation2]   ;;  %s107_s9 = sshll.u32 %s241_s3, 4  ;;  %s108_s9 = int_to_ptr.hbm [resolvable:$true] %s107_s9 }
   0x4   :  { %v151_v4 = vld [vmem:[%s239_s1 + $0x18] sm:$0xff]  ;;  %v150_v5 = vld [vmem:[%s239_s1 + $0x10] sm:$0xff]  ;;  %v149_v6 = vld [vmem:[%s239_s1 + $0x8] sm:$0xff]  ;;  %s105_s6 = sshll.u32 %s184_s5, 4  ;;  %vm98_vm0 = vcmask 74752   ;;  %s106_s6 = int_to_ptr.vmem [resolvable:$true] %s105_s6 }
   0x5   :  { %v148_v7 = vld [vmem:[%s239_s1] sm:$0xff] }
   0x6   :  { %86 = vmatpush.bf16.msra.mxu0 %v154_v1  ;;  %v15_v8 = vld [vmem:[%s238_s0] sm:$0x3] }
   0x7   :  { %v16_v9 = vpack.c.bf16 %v15_v8, %v15_v8  ;;  %v157_v10 = vld [vmem:[%s240_s2] ss:$0 sm:$0xff] }
   0xa   :  { %87 = vmatpush.bf16.msra.mxu0 %v153_v2 }
   0xe   :  { %88 = vmatpush.bf16.msra.mxu0 %v152_v3 }
  0x12   :  { %89 = vmatpush.bf16.msra.mxu0 %v151_v4 }
  0x16   :  { %90 = vmatpush.bf16.msra.mxu0 %v150_v5 }
  0x1a   :  { %91 = vmatpush.bf16.msra.mxu0 %v149_v6 }
  0x1e   :  { %92 = vmatpush.bf16.msra.mxu0 %v148_v7 }
  0x21   :  { %93 = vmatmul.bf16.vlgmr.msra.gmra.mxu0 %v16_v9 }
  0x9e   :  { %v94_v11 = vpop.f32.mrf.mxu0 }
  0x9f   :  { %v95_v12 = vadd.f32 %v157_v10, %v94_v11 }
  0xa1   :  { %99 = vst.msk [vmem:[#allocation2] sm:$0x3] %vm98_vm0, %v95_v12 }
  0xa2   :  { %110 = dma.vmem_to_hbm [thread:$0]  %s106_s6, 32, %s108_s9, [#allocation3]  }
  0xa6   :  { %v96_v13 = vpop.f32.mrf.mxu0 }
  0xa7   :  { %182 = dma.done.wait [#allocation3], 32  }
  0xa8   :  { %183 = vsyncadd [#allocation3], 4294967264 }
  0xa9   :  { %115 = vsyncpa [#allocation3], 1 }

</bundles_post_ra>
